<compile_context>
chip_gen: v7x
topology: tpu7x:2x2x1
jax: 0.10.0
libtpu: 0.0.40
codegen_flags: <defaults>
</compile_context>

<pallas_src>
import functools

import jax
import jax.numpy as jnp
from jax.experimental import pallas as pl
from jax.experimental.pallas import tpu as pltpu


def _round_up(x, m):
    return (x + m - 1) // m * m


def _vq_kernel(z_ref, w_in_ref, cb_ref, v2_ref, w_out_ref,
               zq_ref, idx_ref, err_ref, *, matmul_dtype):
    """One row tile: linear_in -> nearest-code argmin -> lookup -> linear_out."""
    md = matmul_dtype

    z = z_ref[...].astype(md)                                          # (tm, in_ch)

    # linear_in (MXU, f32 accumulation)
    z_e = jnp.dot(z, w_in_ref[...],
                  preferred_element_type=jnp.float32)                  # (tm, emb_ch)

    # Distance without the argmin-invariant |z_e|^2 term.  The factor of 2 is
    # folded into the MXU operand (exact: scaling by 2 commutes with rounding),
    # saving a full VPU pass over the (tm, emb_num) tile.
    ze2 = (z_e + z_e).astype(md)                                       # (tm, emb_ch)
    cross2 = jax.lax.dot_general(ze2, cb_ref[...], (((1,), (1,)), ((), ())),
                                 preferred_element_type=jnp.float32)   # (tm, emb_num)
    dist = v2_ref[...] - cross2                                        # (tm, emb_num)

    # First-argmin along codes (matches torch.argmin tie-breaking), in f32.
    emb_num = dist.shape[-1]
    m = jnp.min(dist, axis=-1, keepdims=True)                          # (tm, 1)
    code_iota = jax.lax.broadcasted_iota(jnp.int32, dist.shape, 1)
    idx = jnp.min(jnp.where(dist == m, code_iota, emb_num), axis=-1)   # (tm,)
    idx = idx.astype(jnp.int32)
    idx_ref[...] = idx.reshape(idx_ref.shape)                          # lane-dense

    # Codebook lookup as one-hot matmul.  Single bool->md cast; one-hot rows
    # are exact in bf16, so z_q is exactly the (md-rounded) codebook row in f32.
    onehot = (code_iota == idx[:, None]).astype(md)                    # (tm, emb_num)
    z_q = jnp.dot(onehot, cb_ref[...],
                  preferred_element_type=jnp.float32)                  # (tm, emb_ch)

    # Per-row squared error computed directly in f32 (no |z_e|^2 + min(dist)
    # cancellation, no clamp): |z_q - z_e|^2.
    d = z_q - z_e
    err_ref[...] = jnp.sum(d * d, axis=-1).reshape(err_ref.shape)      # lane-dense

    # Straight-through forward value is z_q; then linear_out.
    out = jnp.dot(z_q.astype(md), w_out_ref[...],
                  preferred_element_type=jnp.float32)                  # (tm, in_ch)
    zq_ref[...] = out.astype(zq_ref.dtype)


@functools.partial(jax.jit,
                   static_argnames=("commitment_weight", "tm", "matmul_dtype"))
def vector_quantizer_forward(z, w_in, codebook, w_out,
                             commitment_weight=1.0, tm=1024,
                             matmul_dtype=jnp.bfloat16):
    B, N, in_ch = z.shape
    emb_num, emb_ch = codebook.shape
    M = B * N
    md = matmul_dtype

    # ---- static row-tile selection ----
    # Big tiles amortize the ~0.35us per-grid-step overhead; multiple of 128
    # fills MXU rows and keeps idx/err stores lane-dense.
    tm = max(128, (min(tm, _round_up(M, 128)) // 128) * 128)
    # Keep the (tm, emb_num) f32/bf16 intermediates (~16 B/elem) well under the
    # smallest scoped-VMEM budget (v7x: 64 MiB physical, default 32 MiB scoped).
    tm_cap = max(128, ((24 * 1024 * 1024) // (16 * emb_num)) // 128 * 128)
    tm = min(tm, tm_cap)
    # >= 2 tiles so the "parallel" grid axis feeds both v7x TensorCores.
    if M >= 2 * 128:
        tm = min(tm, _round_up(pl.cdiv(M, 2), 128))
    num_tiles = pl.cdiv(M, tm)

    # No wrapper-side pad of z (a full extra HBM read+write): the ragged last
    # row tile is handled by Pallas (OOB reads are garbage rows, OOB writes are
    # dropped; garbage idx/err rows are sliced off below).
    z_flat = z.reshape(M, in_ch)

    # Loop-invariant prep hoisted out of the kernel: dtype casts + |codebook|^2
    # (v2 uses the md-rounded codebook, i.e. the values the lookup returns).
    w_in_c = w_in.astype(md)
    cb_c = codebook.astype(md)
    w_out_c = w_out.astype(md)
    cb_eff = cb_c.astype(jnp.float32)
    v2 = jnp.sum(cb_eff * cb_eff, axis=-1)[None, :]                    # (1, emb_num)

    kernel = functools.partial(_vq_kernel, matmul_dtype=md)

    # NOTE: for multi-MiB codebooks (emb_num in the thousands) block the code
    # axis as a trailing "arbitrary" grid dim with running min/argmin in VMEM
    # scratch, and mark the grid-invariant operands pipeline_mode=pl.Buffered(1)
    # so their VMEM is not double-buffered.  Not needed at these sizes.
    zq_flat, idx_tiles, err_tiles = pl.pallas_call(
        kernel,
        out_shape=(
            jax.ShapeDtypeStruct((M, in_ch), z.dtype),          # native in_ch: no
            jax.ShapeDtypeStruct((num_tiles, 1, tm), jnp.int32),   # 4x padded f32
            jax.ShapeDtypeStruct((num_tiles, 1, tm), jnp.float32), # writeback/slice
        ),
        grid_spec=pltpu.PrefetchScalarGridSpec(
            num_scalar_prefetch=0,
            grid=(num_tiles,),
            in_specs=[
                pl.BlockSpec((tm, in_ch), lambda i: (i, 0)),
                pl.BlockSpec((in_ch, emb_ch), lambda i: (0, 0)),
                pl.BlockSpec((emb_num, emb_ch), lambda i: (0, 0)),
                pl.BlockSpec((1, emb_num), lambda i: (0, 0)),
                pl.BlockSpec((emb_ch, in_ch), lambda i: (0, 0)),
            ],
            out_specs=[
                pl.BlockSpec((tm, in_ch), lambda i: (i, 0)),
                pl.BlockSpec((1, 1, tm), lambda i: (i, 0, 0)),
                pl.BlockSpec((1, 1, tm), lambda i: (i, 0, 0)),
            ],
        ),
        compiler_params=pltpu.CompilerParams(
            dimension_semantics=("parallel",),          # no resident accumulator
            vmem_limit_bytes=64 * 1024 * 1024),         # tm cap keeps usage << this
    )(z_flat, w_in_c, cb_c, v2, w_out_c)

    zq = zq_flat.reshape(B, N, in_ch)                   # exact shape: no slicing
    idx = idx_tiles.reshape(-1)[:M].reshape(B, N)
    err = err_tiles.reshape(-1)[:M]

    mean_sq = jnp.sum(err) / jnp.float32(M * emb_ch)
    # commitment_weight * mean((zq.detach()-z)^2) + mean((zq-z.detach())^2)
    # -> numerically (commitment_weight + 1) * mean((z_q - z_e)^2) in the forward.
    # TODO(synk): straight-through / detach gradient semantics are backward-only
    # and not represented in this forward kernel.
    loss = (jnp.float32(commitment_weight) + 1.0) * mean_sq

    return zq, idx, loss


def _reference(z, w_in, codebook, w_out, commitment_weight=1.0,
               matmul_dtype=jnp.bfloat16):
    """Pure-JAX reference mirroring the kernel's dtype choices.

    With matmul_dtype=jnp.float32 this is exactly the fp32 torch module math.
    """
    B, N, in_ch = z.shape
    md = matmul_dtype
    z_flat = z.reshape(-1, in_ch)
    w_in_c, cb_c, w_out_c = w_in.astype(md), codebook.astype(md), w_out.astype(md)
    cb_eff = cb_c.astype(jnp.float32)

    z_e = jnp.dot(z_flat.astype(md), w_in_c, preferred_element_type=jnp.float32)
    v2 = jnp.sum(cb_eff * cb_eff, axis=-1)
    cross = jax.lax.dot_general(z_e.astype(md), cb_c, (((1,), (1,)), ((), ())),
                                preferred_element_type=jnp.float32)
    dist = v2[None, :] - 2.0 * cross            # |z_e|^2 dropped: argmin-invariant
    idx = jnp.argmin(dist, axis=-1).astype(jnp.int32)
    z_q = cb_eff[idx]
    loss = (commitment_weight + 1.0) * jnp.mean((z_q - z_e) ** 2)
    out = jnp.dot(z_q.astype(md), w_out_c, preferred_element_type=jnp.float32)
    return out.reshape(B, N, in_ch).astype(z.dtype), idx.reshape(B, N), loss


if __name__ == "__main__":
    # Module hyper-params (in_ch != emb_ch so both linear layers are real).
    in_ch, emb_num, emb_ch = 32, 64, 16
    commitment_weight = 1.0

    key = jax.random.PRNGKey(0)
    k_z1, k_z2, k_wi, k_cb, k_wo = jax.random.split(key, 5)

    w_in = jax.random.normal(k_wi, (in_ch, emb_ch), dtype=jnp.float32) * 0.1
    codebook = jax.random.normal(k_cb, (emb_num, emb_ch), dtype=jnp.float32)
    w_out = jax.random.normal(k_wo, (emb_ch, in_ch), dtype=jnp.float32) * 0.1
    # (If in_ch == emb_ch, pass jnp.eye(in_ch) for w_in / w_out == nn.Identity.)

    # Case 1: M = 128 (single tile).  Case 2: M = 300 (two tiles, ragged last).
    test_inputs = [
        jax.random.normal(k_z1, (2, 64, in_ch), dtype=jnp.float32),
        jax.random.normal(k_z2, (3, 100, in_ch), dtype=jnp.float32),
    ]

    for z in test_inputs:
        z_q, indices, loss = vector_quantizer_forward(
            z, w_in, codebook, w_out, commitment_weight=commitment_weight)
        jax.block_until_ready((z_q, indices, loss))

        # sanity check against a pure-JAX reference (same bf16 MXU casts)
        z_q_ref, idx_ref, loss_ref = _reference(z, w_in, codebook, w_out,
                                                commitment_weight)
        assert z_q.shape == z.shape and indices.shape == z.shape[:2]
        assert jnp.allclose(z_q, z_q_ref, atol=2e-4, rtol=2e-4)
        assert bool(jnp.all(indices == idx_ref))
        assert jnp.allclose(loss, loss_ref, atol=1e-4, rtol=1e-3)

    print("KERNEL_OK")
</pallas_src>

<mosaic_0001>
module attributes {stable_mosaic.version = 11 : i64} {
  func.func @_vq_kernel(%arg0: i32, %arg1: memref<128x32xf32, #tpu.memory_space<vmem>>, %arg2: memref<32x16xbf16, #tpu.memory_space<vmem>>, %arg3: memref<64x16xbf16, #tpu.memory_space<vmem>>, %arg4: memref<1x64xf32, #tpu.memory_space<vmem>>, %arg5: memref<16x32xbf16, #tpu.memory_space<vmem>>, %arg6: memref<128x32xf32, #tpu.memory_space<vmem>>, %arg7: memref<1x1x128xi32, #tpu.memory_space<vmem>>, %arg8: memref<1x1x128xf32, #tpu.memory_space<vmem>>) attributes {dimension_semantics = [#tpu.dimension_semantics<parallel>], iteration_bounds = array<i64: 1>, scalar_prefetch = 0 : i64, scratch_operands = 0 : i64, tpu.core_type = #tpu.core_type<tc>, window_params = [{transform_indices = @transform_0, window_bounds = array<i64: 128, 32>}, {pipeline_mode = #tpu.pipeline_mode<synchronous>, transform_indices = @transform_1, window_bounds = array<i64: 32, 16>}, {pipeline_mode = #tpu.pipeline_mode<synchronous>, transform_indices = @transform_2, window_bounds = array<i64: 64, 16>}, {pipeline_mode = #tpu.pipeline_mode<synchronous>, transform_indices = @transform_3, window_bounds = array<i64: 1, 64>}, {pipeline_mode = #tpu.pipeline_mode<synchronous>, transform_indices = @transform_4, window_bounds = array<i64: 16, 32>}, {transform_indices = @transform_5, window_bounds = array<i64: 128, 32>}, {transform_indices = @transform_6, window_bounds = array<i64: 1, 1, 128>}, {transform_indices = @transform_7, window_bounds = array<i64: 1, 1, 128>}]} {
    %c0 = arith.constant 0 : index
    %c0_0 = arith.constant 0 : index
    %0 = vector.load %arg1[%c0, %c0_0] : memref<128x32xf32, #tpu.memory_space<vmem>>, vector<128x32xf32>
    %1 = arith.truncf %0 : vector<128x32xf32> to vector<128x32xbf16>
    %c0_1 = arith.constant 0 : index
    %c0_2 = arith.constant 0 : index
    %2 = vector.load %arg2[%c0_1, %c0_2] : memref<32x16xbf16, #tpu.memory_space<vmem>>, vector<32x16xbf16>
    %cst = arith.constant dense<0.000000e+00> : vector<128x16xf32>
    %3 = tpu.matmul %1, %2, %cst {dimension_numbers = #tpu.dot_dimension_numbers<[1], [0], [0], [1], [0, 0, 1, 1], [], []>} : vector<128x32xbf16>, vector<32x16xbf16>, vector<128x16xf32> -> vector<128x16xf32>
    %4 = arith.addf %3, %3 : vector<128x16xf32>
    %5 = arith.truncf %4 : vector<128x16xf32> to vector<128x16xbf16>
    %c0_3 = arith.constant 0 : index
    %c0_4 = arith.constant 0 : index
    %6 = vector.load %arg3[%c0_3, %c0_4] : memref<64x16xbf16, #tpu.memory_space<vmem>>, vector<64x16xbf16>
    %cst_5 = arith.constant dense<0.000000e+00> : vector<128x64xf32>
    %7 = tpu.matmul %5, %6, %cst_5 {dimension_numbers = #tpu.dot_dimension_numbers<[1], [1], [0], [0], [0, 0, 1, 0], [], []>} : vector<128x16xbf16>, vector<64x16xbf16>, vector<128x64xf32> -> vector<128x64xf32>
    %c0_6 = arith.constant 0 : index
    %c0_7 = arith.constant 0 : index
    %8 = vector.load %arg4[%c0_6, %c0_7] : memref<1x64xf32, #tpu.memory_space<vmem>>, vector<1x64xf32>
    %9 = vector.broadcast %8 : vector<1x64xf32> to vector<128x64xf32>
    %10 = arith.subf %9, %7 : vector<128x64xf32>
    %cst_8 = arith.constant dense<0x7F800000> : vector<128xf32>
    %11 = vector.multi_reduction <minimumf>, %10, %cst_8 [1] : vector<128x64xf32> to vector<128xf32>
    %12 = vector.shape_cast %11 : vector<128xf32> to vector<128x1xf32>
    %13 = tpu.iota {dimensions = array<i32: 1>} : vector<128x64xi32>
    %14 = vector.broadcast %12 : vector<128x1xf32> to vector<128x64xf32>
    %15 = arith.cmpf oeq, %10, %14 : vector<128x64xf32>
    %c64_i32 = arith.constant 64 : i32
    %16 = vector.broadcast %c64_i32 : i32 to vector<128x64xi32>
    %17 = arith.select %15, %13, %16 : vector<128x64xi1>, vector<128x64xi32>
    %cst_9 = arith.constant dense<2147483647> : vector<128xi32>
    %18 = vector.multi_reduction <minsi>, %17, %cst_9 [1] : vector<128x64xi32> to vector<128xi32>
    %19 = vector.shape_cast %18 : vector<128xi32> to vector<1x1x128xi32>
    %c0_10 = arith.constant 0 : index
    %c0_11 = arith.constant 0 : index
    %c0_12 = arith.constant 0 : index
    %20 = vector.load %arg7[%c0_10, %c0_11, %c0_12] : memref<1x1x128xi32, #tpu.memory_space<vmem>>, vector<1x1x128xi32>
    tpu.vector_store %arg7[%c0_10, %c0_11, %c0_12], %19 {strides = array<i32>} : memref<1x1x128xi32, #tpu.memory_space<vmem>>, vector<1x1x128xi32>,
    %21 = vector.shape_cast %18 : vector<128xi32> to vector<128x1xi32>
    %22 = vector.broadcast %21 : vector<128x1xi32> to vector<128x64xi32>
    %23 = arith.cmpi eq, %13, %22 : vector<128x64xi32>
    %24 = arith.extui %23 : vector<128x64xi1> to vector<128x64xi32>
    %25 = arith.sitofp %24 : vector<128x64xi32> to vector<128x64xf32>
    %26 = arith.truncf %25 : vector<128x64xf32> to vector<128x64xbf16>
    %c0_13 = arith.constant 0 : index
    %c0_14 = arith.constant 0 : index
    %27 = vector.load %arg3[%c0_13, %c0_14] : memref<64x16xbf16, #tpu.memory_space<vmem>>, vector<64x16xbf16>
    %cst_15 = arith.constant dense<0.000000e+00> : vector<128x16xf32>
    %28 = tpu.matmul %26, %27, %cst_15 {dimension_numbers = #tpu.dot_dimension_numbers<[1], [0], [0], [1], [0, 0, 1, 1], [], []>} : vector<128x64xbf16>, vector<64x16xbf16>, vector<128x16xf32> -> vector<128x16xf32>
    %29 = arith.subf %28, %3 : vector<128x16xf32>
    %30 = arith.mulf %29, %29 : vector<128x16xf32>
    %cst_16 = arith.constant dense<0.000000e+00> : vector<128xf32>
    %31 = vector.multi_reduction <add>, %30, %cst_16 [1] : vector<128x16xf32> to vector<128xf32>
    %32 = vector.shape_cast %31 : vector<128xf32> to vector<1x1x128xf32>
    %c0_17 = arith.constant 0 : index
    %c0_18 = arith.constant 0 : index
    %c0_19 = arith.constant 0 : index
    %33 = vector.load %arg8[%c0_17, %c0_18, %c0_19] : memref<1x1x128xf32, #tpu.memory_space<vmem>>, vector<1x1x128xf32>
    tpu.vector_store %arg8[%c0_17, %c0_18, %c0_19], %32 {strides = array<i32>} : memref<1x1x128xf32, #tpu.memory_space<vmem>>, vector<1x1x128xf32>,
    %34 = arith.truncf %28 : vector<128x16xf32> to vector<128x16xbf16>
    %c0_20 = arith.constant 0 : index
    %c0_21 = arith.constant 0 : index
    %35 = vector.load %arg5[%c0_20, %c0_21] : memref<16x32xbf16, #tpu.memory_space<vmem>>, vector<16x32xbf16>
    %cst_22 = arith.constant dense<0.000000e+00> : vector<128x32xf32>
    %36 = tpu.matmul %34, %35, %cst_22 {dimension_numbers = #tpu.dot_dimension_numbers<[1], [0], [0], [1], [0, 0, 1, 1], [], []>} : vector<128x16xbf16>, vector<16x32xbf16>, vector<128x32xf32> -> vector<128x32xf32>
    %c0_23 = arith.constant 0 : index
    %c0_24 = arith.constant 0 : index
    %37 = vector.load %arg6[%c0_23, %c0_24] : memref<128x32xf32, #tpu.memory_space<vmem>>, vector<128x32xf32>
    tpu.vector_store %arg6[%c0_23, %c0_24], %36 {strides = array<i32>} : memref<128x32xf32, #tpu.memory_space<vmem>>, vector<128x32xf32>,
    return
  }
  func.func @transform_0(%arg0: i32) -> (i32, i32) {
    %c0_i32 = arith.constant 0 : i32
    %c0_i32_0 = arith.constant 0 : i32
    return %arg0, %c0_i32 : i32, i32
  }
  func.func @transform_1(%arg0: i32) -> (i32, i32) {
    %c0_i32 = arith.constant 0 : i32
    %c0_i32_0 = arith.constant 0 : i32
    %c0_i32_1 = arith.constant 0 : i32
    return %c0_i32, %c0_i32_0 : i32, i32
  }
  func.func @transform_2(%arg0: i32) -> (i32, i32) {
    %c0_i32 = arith.constant 0 : i32
    %c0_i32_0 = arith.constant 0 : i32
    %c0_i32_1 = arith.constant 0 : i32
    return %c0_i32, %c0_i32_0 : i32, i32
  }
  func.func @transform_3(%arg0: i32) -> (i32, i32) {
    %c0_i32 = arith.constant 0 : i32
    %c0_i32_0 = arith.constant 0 : i32
    %c0_i32_1 = arith.constant 0 : i32
    return %c0_i32, %c0_i32_0 : i32, i32
  }
  func.func @transform_4(%arg0: i32) -> (i32, i32) {
    %c0_i32 = arith.constant 0 : i32
    %c0_i32_0 = arith.constant 0 : i32
    %c0_i32_1 = arith.constant 0 : i32
    return %c0_i32, %c0_i32_0 : i32, i32
  }
  func.func @transform_5(%arg0: i32) -> (i32, i32) {
    %c0_i32 = arith.constant 0 : i32
    %c0_i32_0 = arith.constant 0 : i32
    return %arg0, %c0_i32 : i32, i32
  }
  func.func @transform_6(%arg0: i32) -> (i32, i32, i32) {
    %c0_i32 = arith.constant 0 : i32
    %c0_i32_0 = arith.constant 0 : i32
    %c0_i32_1 = arith.constant 0 : i32
    return %arg0, %c0_i32, %c0_i32_0 : i32, i32, i32
  }
  func.func @transform_7(%arg0: i32) -> (i32, i32, i32) {
    %c0_i32 = arith.constant 0 : i32
    %c0_i32_0 = arith.constant 0 : i32
    %c0_i32_1 = arith.constant 0 : i32
    return %arg0, %c0_i32, %c0_i32_0 : i32, i32, i32
  }
}

</mosaic_0001>

<bundles_post_ra>
// kernel: vector_quantizer_forward.1
= control target key start
LH: loop header
LB: loop body
LE: loop exit
PB: predicated region body
PF: predicated region fallthrough
CT: control target
= control target key end

     0   :  { %13 = vsyncpa [#allocation3], 0  ;;  %s2715_s0 = inlined_call_operand.hbm [shape: f32[128,32], index: 0, kind: input, shape index: {}]   ;;  %s2716_s1 = inlined_call_operand.hbm [shape: bf16[32,16], index: 1, kind: input, shape index: {}]   ;;  %s2717_s2 = inlined_call_operand.hbm [shape: bf16[64,16], index: 2, kind: input, shape index: {}]   ;;  %s2718_s3 = inlined_call_operand.hbm [shape: f32[1,64], index: 3, kind: input, shape index: {}]   ;;  %s2719_s4 = inlined_call_operand.hbm [shape: bf16[16,32], index: 4, kind: input, shape index: {}]   ;;  %s2720_s5 = inlined_call_operand.hbm [shape: f32[128,32], index: 5, kind: output, shape index: {0}]   ;;  %s2721_s6 = inlined_call_operand.hbm [shape: s32[1,1,128], index: 6, kind: output, shape index: {1}]   ;;  %s2722_s7 = inlined_call_operand.hbm [shape: f32[1,1,128], index: 7, kind: output, shape index: {2}]  }
   0x1   :  { %14 = vsyncpa [#allocation6], 0 }
   0x2   :  { %15 = vsyncpa [#allocation9], 0 }
   0x3   :  { %16 = vsyncpa [#allocation4], 0 }
   0x4   :  { %17 = vsyncpa [#allocation13], 0  ;;  %s1886_s24 = smov [#allocation5]   ;;  %s1700_s28 = scalar_lea.hbm %s2716_s1, 256 }
   0x5   :  { %s35_s25 = sshll.u32 %s1886_s24, 4  ;;  %p1701_p0 = scmp.ne.s32.totalorder %s2716_s1, %s1700_s28  ;;  %s36_s25 = int_to_ptr.vmem [resolvable:$true] %s35_s25 }
   0x6   :  { %p1704_p1 = scmp.lt.u32.totalorder %s1700_s28, %s2716_s1 }
   0x8   :  { %p1706_p2 = pnand %p1704_p1, %p1701_p0 }
   0xa   :  { %1709 = shalt.err (!%p1706_p2)
}
   0xb   :  { %s1710_s10 = scalar_lea.vmem %s36_s25, 256  ;;  %p1715_p4 = scmp.lt.s32.totalorder %s36_s25, %s36_s25 }
   0xc   :  { %p1711_p3 = scmp.ne.s32.totalorder %s36_s25, %s1710_s10  ;;  %p1716_p5 = scmp.lt.s32.totalorder %s1710_s10, %s1710_s10 }
   0xe   :  { %p1717_p6 = por %p1716_p5, %p1715_p4 }
  0x10   :  { %p1718_p7 = pnand %p1717_p6, %p1711_p3 }
  0x12   :  { %1721 = shalt.err (!%p1718_p7)
}
  0x13   :  { %s1887_s11 = smov 64   ;;  %s1888_s12 = smov 4  }
  0x14   :  { %41 = dma.hbm_to_vmem [thread:$0]  %s2716_s1, 256, %s36_s25, [#allocation6], %s1887_s11, %s1887_s11, %s1888_s12  }
  0x15   :  { %s1889_s15 = smov [#allocation8]   ;;  %s1890_s17 = smov [#allocation2]  }
  0x16   :  { %s60_s16 = sshll.u32 %s1889_s15, 4  ;;  %s23_s18 = sshll.u32 %s1890_s17, 4  ;;  %s61_s16 = int_to_ptr.vmem [resolvable:$true] %s60_s16  ;;  %s24_s18 = int_to_ptr.vmem [resolvable:$true] %s23_s18 }
  0x17   :  { %s1722_s21 = scalar_lea.hbm %s2718_s3, 16 }
  0x18   :  { %p1723_p8 = scmp.ne.s32.totalorder %s2718_s3, %s1722_s21  ;;  %p1726_p9 = scmp.lt.u32.totalorder %s1722_s21, %s2718_s3 }
  0x1a   :  { %p1728_p10 = pnand %p1726_p9, %p1723_p8 }
  0x1c   :  { %1731 = shalt.err (!%p1728_p10)
}
  0x1d   :  { %s1732_s1 = scalar_lea.vmem %s61_s16, 16  ;;  %s1736_s25 = scalar_lea.vmem %s61_s16, 32 }
  0x1e   :  { %p1733_p11 = scmp.ne.s32.totalorder %s61_s16, %s1732_s1  ;;  %p1737_p12 = scmp.lt.s32.totalorder %s61_s16, %s61_s16 }
  0x1f   :  { %p1738_p13 = scmp.lt.s32.totalorder %s1736_s25, %s1732_s1 }
  0x21   :  { %p1739_p0 = por %p1738_p13, %p1737_p12 }
  0x23   :  { %p1740_p1 = pnand %p1739_p0, %p1733_p11 }
  0x25   :  { %1743 = shalt.err (!%p1740_p1)
}
  0x26   :  { %63 = dma.hbm_to_vmem [thread:$0]  %s2718_s3, 16, %s61_s16, [#allocation9]  }
  0x27   :  { %s1744_s8 = scalar_lea.hbm %s2715_s0, 2048 }
  0x28   :  { %p1745_p2 = scmp.ne.s32.totalorder %s2715_s0, %s1744_s8  ;;  %p1748_p3 = scmp.lt.u32.totalorder %s1744_s8, %s2715_s0 }
  0x2a   :  { %p1750_p4 = pnand %p1748_p3, %p1745_p2 }
  0x2c   :  { %1753 = shalt.err (!%p1750_p4)
}
  0x2d   :  { %s1754_s15 = scalar_lea.vmem %s24_s18, 2048  ;;  %p1759_p6 = scmp.lt.s32.totalorder %s24_s18, %s24_s18 }
  0x2e   :  { %p1755_p5 = scmp.ne.s32.totalorder %s24_s18, %s1754_s15  ;;  %p1760_p7 = scmp.lt.s32.totalorder %s1754_s15, %s1754_s15 }
  0x30   :  { %p1761_p8 = por %p1760_p7, %p1759_p6 }
  0x32   :  { %p1762_p9 = pnand %p1761_p8, %p1755_p5 }
  0x34   :  { %1765 = shalt.err (!%p1762_p9)
}
  0x35   :  { %s1891_s3 = smov 128   ;;  %s1892_s16 = smov 8  }
  0x36   :  { %29 = dma.hbm_to_vmem [thread:$0]  %s2715_s0, 2048, %s24_s18, [#allocation3], %s1891_s3, %s1891_s3, %s1892_s16  }
  0x37   :  { %s1893_s20 = smov [#allocation7]   ;;  %s1894_s22 = smov [#allocation10]  }
  0x38   :  { %s47_s21 = sshll.u32 %s1893_s20, 4  ;;  %s69_s23 = sshll.u32 %s1894_s22, 4  ;;  %s48_s21 = int_to_ptr.vmem [resolvable:$true] %s47_s21  ;;  %s70_s23 = int_to_ptr.vmem [resolvable:$true] %s69_s23 }
  0x39   :  { %s1766_s1 = scalar_lea.hbm %s2717_s2, 512 }
  0x3a   :  { %p1767_p10 = scmp.ne.s32.totalorder %s2717_s2, %s1766_s1  ;;  %p1770_p11 = scmp.lt.u32.totalorder %s1766_s1, %s2717_s2 }
  0x3c   :  { %p1772_p12 = pnand %p1770_p11, %p1767_p10 }
  0x3e   :  { %1775 = shalt.err (!%p1772_p12)
}
  0x3f   :  { %s1776_s0 = scalar_lea.vmem %s48_s21, 512  ;;  %p1781_p0 = scmp.lt.s32.totalorder %s48_s21, %s48_s21 }
  0x40   :  { %p1777_p13 = scmp.ne.s32.totalorder %s48_s21, %s1776_s0  ;;  %p1782_p1 = scmp.lt.s32.totalorder %s1776_s0, %s1776_s0 }
  0x42   :  { %p1783_p2 = por %p1782_p1, %p1781_p0 }
  0x44   :  { %p1784_p3 = pnand %p1783_p2, %p1777_p13 }
  0x46   :  { %1787 = shalt.err (!%p1784_p3)
}
  0x47   :  { %53 = dma.hbm_to_vmem [thread:$0]  %s2717_s2, 512, %s48_s21, [#allocation6], %s1887_s11, %s1887_s11, %s1888_s12  }
  0x48   :  { %s1788_s10 = scalar_lea.hbm %s2719_s4, 128 }
  0x49   :  { %p1789_p4 = scmp.ne.s32.totalorder %s2719_s4, %s1788_s10  ;;  %p1792_p5 = scmp.lt.u32.totalorder %s1788_s10, %s2719_s4 }
  0x4b   :  { %p1794_p6 = pnand %p1792_p5, %p1789_p4 }
  0x4d   :  { %1797 = shalt.err (!%p1794_p6)
}
  0x4e   :  { %s1798_s19 = scalar_lea.vmem %s70_s23, 128  ;;  %p1803_p8 = scmp.lt.s32.totalorder %s70_s23, %s70_s23 }
  0x4f   :  { %p1799_p7 = scmp.ne.s32.totalorder %s70_s23, %s1798_s19  ;;  %p1804_p9 = scmp.lt.s32.totalorder %s1798_s19, %s1798_s19 }
  0x51   :  { %p1805_p10 = por %p1804_p9, %p1803_p8 }
  0x53   :  { %p1806_p11 = pnand %p1805_p10, %p1799_p7 }
  0x55   :  { %1809 = shalt.err (!%p1806_p11)
}
  0x56   :  { %75 = dma.hbm_to_vmem [thread:$0]  %s2719_s4, 128, %s70_s23, [#allocation9], %s1887_s11, %s1887_s11, %s1888_s12  }
  0x57   :  { %1876 = dma.done.wait [#allocation3], 2048  }
  0x58   :  { %1877 = vsyncadd [#allocation3], 4294965248 }
  0x59   :  { %1878 = dma.done.wait [#allocation6], 768  }
  0x5a   :  { %1879 = vsyncadd [#allocation6], 4294966528 }
  0x5b   :  { %1880 = dma.done.wait [#allocation9], 144  }
  0x5c   :  { %1881 = vsyncadd [#allocation9], 4294967152  ;;  %v1689_v0 = vld [vmem:[#allocation5] sm:$0xff]   ;;  %v1690_v1 = vld [vmem:[#allocation5 + $0x8] sm:$0xff]   ;;  %vm2723_vm0 = vcmask 261120   ;;  %vm306_vm1 = vcmask 130048  }
  0x5d   :  { %1584 = vmatprep.subr.bf16.mxu0 %v1689_v0  ;;  %v92_v2 = vld [vmem:[#allocation2] sm:$0xff]  ;;  %v93_v3 = vld [vmem:[#allocation2 + $0x8] sm:$0xff]  ;;  %v94_v5 = vld [vmem:[#allocation2 + $0x10] sm:$0xff]  ;;  %vm463_vm2 = vcmask 523264   ;;  %s1896_s4 = smov [#allocation12]  }
  0x5e   :  { %1585 = vmatpush3.bf16.msra.mxu0 %v1689_v0  ;;  %v108_v4 = vpack.c.bf16 %v93_v3, %v92_v2  ;;  %v95_v6 = vld [vmem:[#allocation2 + $0x18] sm:$0xff]  ;;  %v96_v7 = vld [vmem:[#allocation2 + $0x20] sm:$0xff]  ;;  %v97_v8 = vld [vmem:[#allocation2 + $0x28] sm:$0xff]  ;;  %s1453_s11 = sshll.u32 %s1896_s4, 4  ;;  %s1454_s11 = int_to_ptr.vmem [resolvable:$true] %s1453_s11 }
  0x5f   :  { %1586 = vmatprep.subr.bf16.mxu0 %v1690_v1  ;;  %v109_v9 = vpack.c.bf16 %v95_v6, %v94_v5  ;;  %v110_v10 = vpack.c.bf16 %v97_v8, %v96_v7  ;;  %v1691_v11 = vld [vmem:[#allocation7] sm:$0xff]   ;;  %v1692_v13 = vld [vmem:[#allocation7 + $0x8] sm:$0xff]   ;;  %v100_v16 = vld [vmem:[#allocation2 + $0x40] sm:$0xff]  ;;  %s1810_s12 = scalar_lea.vmem %s1454_s11, 16  ;;  %s1814_s21 = scalar_lea.vmem %s1454_s11, 32 }
  0x60   :  { %1588 = vmatprep.mubr.msk.bf16.mxu0 %vm2723_vm0, %v108_v4  ;;  %v98_v12 = vld [vmem:[#allocation2 + $0x30] sm:$0xff]  ;;  %v99_v14 = vld [vmem:[#allocation2 + $0x38] sm:$0xff]  ;;  %1672 = vmatprep.subr.msk.bf16.mxu1 %vm306_vm1, %v1691_v11  ;;  %v332_v15 = vsel %vm306_vm1, %v1691_v11, 0  ;;  %v101_v17 = vld [vmem:[#allocation2 + $0x48] sm:$0xff]  ;;  %v335_v20 = vsel %vm306_vm1, %v1692_v13, 0  ;;  %p1811_p12 = scmp.ne.s32.totalorder %s1454_s11, %s1810_s12  ;;  %p1815_p13 = scmp.lt.s32.totalorder %s1454_s11, %s1454_s11 }
  0x61   :  { %1605 = vmatpush3.bf16.xpose.msra.mxu1 %v332_v15  ;;  %v111_v18 = vpack.c.bf16 %v99_v14, %v98_v12  ;;  %v112_v19 = vpack.c.bf16 %v101_v17, %v100_v16  ;;  %v1693_v21 = vld [vmem:[#allocation7 + $0x10] sm:$0xff]   ;;  %v102_v22 = vld [vmem:[#allocation2 + $0x50] sm:$0xff]  ;;  %v103_v23 = vld [vmem:[#allocation2 + $0x58] sm:$0xff]  ;;  %p1816_p0 = scmp.lt.s32.totalorder %s1814_s21, %s1810_s12 }
  0x62   :  { %1587 = vmatpush3.bf16.msra.mxu0 %v1690_v1  ;;  %1673 = vmatprep.subr.msk.bf16.mxu1 %vm306_vm1, %v1692_v13  ;;  %v104_v24 = vld [vmem:[#allocation2 + $0x60] sm:$0xff]  ;;  %v105_v25 = vld [vmem:[#allocation2 + $0x68] sm:$0xff]  ;;  %v113_v26 = vpack.c.bf16 %v103_v23, %v102_v22  ;;  %v338_v28 = vsel %vm306_vm1, %v1693_v21, 0  ;;  %v106_v29 = vld [vmem:[#allocation2 + $0x70] sm:$0xff] }
  0x63   :  { %v114_v27 = vpack.c.bf16 %v105_v25, %v104_v24  ;;  %v107_v30 = vld [vmem:[#allocation2 + $0x78] sm:$0xff]  ;;  %v1694_v32 = vld [vmem:[#allocation7 + $0x18] sm:$0xff]   ;;  %p1817_p1 = por %p1816_p0, %p1815_p13 }
  0x64   :  { %v115_v31 = vpack.c.bf16 %v107_v30, %v106_v29  ;;  %v341_v33 = vsel %vm306_vm1, %v1694_v32, 0 }
  0x65   :  { %1589 = vmatmul.mubr.msk.bf16.vlgmr.msra.gmra.mrb[0].mxu0 %vm2723_vm0, %v109_v9  ;;  %p1818_p2 = pnand %p1817_p1, %p1811_p12 }
  0x66   :  { %1592 = vmatprep.mubr.msk.bf16.mxu0 %vm2723_vm0, %v110_v10  ;;  %v1503_v10 = vld [vmem:[#allocation8] ss:$0 sm:$0xff] }
  0x69   :  { %1607 = vmatpush3.bf16.xpose.msra.mxu1 %v335_v20 }
  0x6a   :  { %1674 = vmatprep.subr.msk.bf16.mxu1 %vm306_vm1, %v1693_v21 }
  0x6d   :  { %1593 = vmatmul.mubr.msk.bf16.gmra.mrb[4].mxu0 %vm2723_vm0, %v111_v18 }
  0x6e   :  { %1596 = vmatprep.mubr.msk.bf16.mxu0 %vm2723_vm0, %v112_v19 }
  0x71   :  { %1609 = vmatpush3.bf16.xpose.msra.mxu1 %v338_v28 }
  0x72   :  { %1675 = vmatprep.subr.msk.bf16.mxu1 %vm306_vm1, %v1694_v32 }
  0x75   :  { %1597 = vmatmul.mubr.msk.bf16.gmra.mrb[8].mxu0 %vm2723_vm0, %v113_v26 }
  0x76   :  { %1600 = vmatprep.mubr.msk.bf16.mxu0 %vm2723_vm0, %v114_v27 }
  0x79   :  { %1611 = vmatpush3.bf16.xpose.msra.mxu1 %v341_v33 }
  0x7d   :  { %1601 = vmatmul.mubr.msk.bf16.gmra.mrb[12].mxu0 %vm2723_vm0, %v115_v31 }
 0x138   :  { %v2027_v34 = vpop.f32.mrb[0].mxu0 }
 0x139   :  { %v2029_v35 = vpop.f32.mrb[1].mxu0  ;;  %v256_v37 = vadd.f32 %v2027_v34, %v2027_v34 }
 0x13a   :  { %v2031_v36 = vpop.f32.mrb[2].mxu0  ;;  %v254_v40 = vadd.f32 %v2029_v35, %v2029_v35 }
 0x13b   :  { %v257_v38 = vadd.f32 %v2031_v36, %v2031_v36  ;;  %v2037_v39 = vpop.f32.mrb[3].mxu0 }
 0x13c   :  { %v255_v41 = vadd.f32 %v2037_v39, %v2037_v39 }
 0x13d   :  { %v271_v42 = vpack.c.bf16 %v257_v38, %v256_v37 }
 0x13e   :  { %v270_v43 = vpack.c.bf16 %v255_v41, %v254_v40 }
 0x140   :  { %v2043_v44 = vpop.f32.mrb[4].mxu0  ;;  %1612 = vmatprep.mubr.msk.bf16.mxu1 %vm306_vm1, %v270_v43 }
 0x141   :  { %v260_v45 = vadd.f32 %v2043_v44, %v2043_v44  ;;  %v2048_v46 = vpop.f32.mrb[5].mxu0  ;;  %1613 = vmatmul.mubr.msk.bf16.vlgmr.msra.gmra.mrb[0].mxu1 %vm306_vm1, %v271_v42 }
 0x142   :  { %v258_v47 = vadd.f32 %v2048_v46, %v2048_v46  ;;  %v2053_v48 = vpop.f32.mrb[6].mxu0 }
 0x143   :  { %v261_v49 = vadd.f32 %v2053_v48, %v2053_v48  ;;  %v2057_v50 = vpop.f32.mrb[7].mxu0 }
 0x144   :  { %v259_v51 = vadd.f32 %v2057_v50, %v2057_v50 }
 0x145   :  { %v273_v52 = vpack.c.bf16 %v261_v49, %v260_v45 }
 0x146   :  { %v272_v53 = vpack.c.bf16 %v259_v51, %v258_v47 }
 0x148   :  { %v2061_v54 = vpop.f32.mrb[8].mxu0  ;;  %1616 = vmatprep.mubr.msk.bf16.mxu1 %vm306_vm1, %v272_v53 }
 0x149   :  { %v264_v55 = vadd.f32 %v2061_v54, %v2061_v54  ;;  %v2066_v56 = vpop.f32.mrb[9].mxu0  ;;  %1617 = vmatmul.mubr.msk.bf16.gmra.mrb[4].mxu1 %vm306_vm1, %v273_v52 }
 0x14a   :  { %v262_v57 = vadd.f32 %v2066_v56, %v2066_v56  ;;  %v2071_v58 = vpop.f32.mrb[10].mxu0 }
 0x14b   :  { %v265_v59 = vadd.f32 %v2071_v58, %v2071_v58  ;;  %v2075_v60 = vpop.f32.mrb[11].mxu0 }
 0x14c   :  { %v263_v61 = vadd.f32 %v2075_v60, %v2075_v60 }
 0x14d   :  { %v275_v62 = vpack.c.bf16 %v265_v59, %v264_v55 }
 0x14e   :  { %v274_v63 = vpack.c.bf16 %v263_v61, %v262_v57 }
 0x150   :  { %v2079_v0 = vpop.f32.mrb[12].mxu0  ;;  %1620 = vmatprep.mubr.msk.bf16.mxu1 %vm306_vm1, %v274_v63 }
 0x151   :  { %v268_v1 = vadd.f32 %v2079_v0, %v2079_v0  ;;  %v2084_v2 = vpop.f32.mrb[13].mxu0  ;;  %1621 = vmatmul.mubr.msk.bf16.gmra.mrb[8].mxu1 %vm306_vm1, %v275_v62 }
 0x152   :  { %v266_v3 = vadd.f32 %v2084_v2, %v2084_v2  ;;  %v2089_v4 = vpop.f32.mrb[14].mxu0 }
 0x153   :  { %v269_v5 = vadd.f32 %v2089_v4, %v2089_v4  ;;  %v2093_v6 = vpop.f32.mrb[15].mxu0 }
 0x154   :  { %v267_v7 = vadd.f32 %v2093_v6, %v2093_v6 }
 0x155   :  { %v277_v8 = vpack.c.bf16 %v269_v5, %v268_v1 }
 0x156   :  { %v276_v9 = vpack.c.bf16 %v267_v7, %v266_v3 }
 0x158   :  { %1624 = vmatprep.mubr.msk.bf16.mxu1 %vm306_vm1, %v276_v9 }
 0x159   :  { %1625 = vmatmul.mubr.msk.bf16.gmra.mrb[12].mxu1 %vm306_vm1, %v277_v8 }
 0x214   :  { %v1614_v11 = vpop.f32.mrb[0].mxu1 }
 0x215   :  { %v2099_v12 = vsub.f32 %v1503_v10, %v1614_v11  ;;  %v377_v13 = vpop.f32.mrb[1].mxu1 }
 0x216   :  { %v2101_v14 = vsub.f32 %v1503_v10, %v377_v13  ;;  %v1615_v15 = vpop.f32.mrb[2].mxu1  ;;  %v512_v13 = vlaneseq }
 0x217   :  { %v2103_v16 = vsub.f32 %v1503_v10, %v1615_v15  ;;  %v380_v17 = vpop.f32.mrb[3].mxu1  ;;  %v470_v18 = vsel %vm463_vm2, %v2099_v12, inf }
 0x218   :  { %v2107_v19 = vsub.f32 %v1503_v10, %v380_v17  ;;  %471 = vmin.xlane.f32.xlu1 %v470_v18  ;;  %v464_v20 = vsel %vm463_vm2, %v2101_v14, inf  ;;  %v2164_v15 = vand.u32 127, %v512_v13 }
 0x219   :  { %465 = vmin.xlane.f32.xlu0 %v464_v20  ;;  %v473_v21 = vsel %vm463_vm2, %v2103_v16, inf }
 0x21a   :  { %v467_v23 = vsel %vm463_vm2, %v2107_v19, inf }
 0x21c   :  { %474 = vmin.xlane.f32.xlu1 %v473_v21  ;;  %v1618_v22 = vpop.f32.mrb[4].mxu1 }
 0x21d   :  { %468 = vmin.xlane.f32.xlu0 %v467_v23  ;;  %v393_v24 = vpop.f32.mrb[5].mxu1  ;;  %v2117_v28 = vsub.f32 %v1503_v10, %v1618_v22 }
 0x21e   :  { %v2115_v25 = vsub.f32 %v1503_v10, %v393_v24  ;;  %v1619_v26 = vpop.f32.mrb[6].mxu1 }
 0x21f   :  { %v396_v27 = vpop.f32.mrb[7].mxu1  ;;  %v2123_v31 = vsub.f32 %v1503_v10, %v1619_v26  ;;  %v482_v37 = vsel %vm463_vm2, %v2117_v28, inf }
 0x220   :  { %v2119_v29 = vsub.f32 %v1503_v10, %v396_v27  ;;  %v476_v30 = vsel %vm463_vm2, %v2115_v25, inf }
 0x221   :  { %477 = vmin.xlane.f32.xlu0 %v476_v30  ;;  %v485_v42 = vsel %vm463_vm2, %v2123_v31, inf }
 0x222   :  { %v479_v32 = vsel %vm463_vm2, %v2119_v29, inf }
 0x223   :  { %480 = vmin.xlane.f32.xlu1 %v479_v32 }
 0x224   :  { %v1622_v33 = vpop.f32.mrb[8].mxu1 }
 0x225   :  { %483 = vmin.xlane.f32.xlu0 %v482_v37  ;;  %v409_v38 = vpop.f32.mrb[9].mxu1  ;;  %v2133_v45 = vsub.f32 %v1503_v10, %v1622_v33 }
 0x226   :  { %v2129_v40 = vsub.f32 %v1503_v10, %v409_v38  ;;  %v1623_v41 = vpop.f32.mrb[10].mxu1 }
 0x227   :  { %486 = vmin.xlane.f32.xlu1 %v485_v42  ;;  %v412_v43 = vpop.f32.mrb[11].mxu1  ;;  %v2139_v51 = vsub.f32 %v1503_v10, %v1623_v41  ;;  %v494_v55 = vsel %vm463_vm2, %v2133_v45, inf }
 0x228   :  { %v2135_v47 = vsub.f32 %v1503_v10, %v412_v43  ;;  %v488_v49 = vsel %vm463_vm2, %v2129_v40, inf }
 0x229   :  { %489 = vmin.xlane.f32.xlu0 %v488_v49  ;;  %v497_v62 = vsel %vm463_vm2, %v2139_v51, inf }
 0x22a   :  { %v491_v52 = vsel %vm463_vm2, %v2135_v47, inf }
 0x22b   :  { %492 = vmin.xlane.f32.xlu1 %v491_v52 }
 0x22c   :  { %v1626_v53 = vpop.f32.mrb[12].mxu1 }
 0x22d   :  { %495 = vmin.xlane.f32.xlu0 %v494_v55  ;;  %v425_v57 = vpop.f32.mrb[13].mxu1  ;;  %v2149_v1 = vsub.f32 %v1503_v10, %v1626_v53 }
 0x22e   :  { %v2145_v59 = vsub.f32 %v1503_v10, %v425_v57  ;;  %v1627_v61 = vpop.f32.mrb[14].mxu1 }
 0x22f   :  { %498 = vmin.xlane.f32.xlu1 %v497_v62  ;;  %v428_v63 = vpop.f32.mrb[15].mxu1  ;;  %v2155_v7 = vsub.f32 %v1503_v10, %v1627_v61  ;;  %v506_v9 = vsel %vm463_vm2, %v2149_v1, inf }
 0x230   :  { %v2151_v3 = vsub.f32 %v1503_v10, %v428_v63  ;;  %v500_v5 = vsel %vm463_vm2, %v2145_v59, inf }
 0x231   :  { %501 = vmin.xlane.f32.xlu0 %v500_v5  ;;  %v509_v11 = vsel %vm463_vm2, %v2155_v7, inf }
 0x232   :  { %v503_v8 = vsel %vm463_vm2, %v2151_v3, inf }
 0x233   :  { %504 = vmin.xlane.f32.xlu1 %v503_v8 }
 0x235   :  { %507 = vmin.xlane.f32.xlu0 %v506_v9 }
 0x237   :  { %510 = vmin.xlane.f32.xlu1 %v509_v11 }
 0x2a5   :  { %v472_v17 = vpop.xlane.xlu1 %471 }
 0x2a6   :  { %vm516_vm3 = vcmp.eq.f32.partialorder %v2099_v12, %v472_v17  ;;  %v466_v10 = vpop.xlane.xlu0 %465 }
 0x2a7   :  { %v532_v18 = vsel %vm516_vm3, %v2164_v15, 64  ;;  %vm514_vm4 = vcmp.eq.f32.partialorder %v2101_v14, %v466_v10 }
 0x2a8   :  { %v530_v20 = vsel %vm514_vm4, %v2164_v15, 64  ;;  %v2171_v21 = vsel %vm463_vm2, %v532_v18, 2147483647 }
 0x2a9   :  { %v2174_v22 = vsel %vm463_vm2, %v530_v20, 2147483647  ;;  %v475_v23 = vpop.xlane.xlu1 %474  ;;  %v578_v30 = vshra.s32 %v2171_v21, 16 }
 0x2aa   :  { %vm517_vm5 = vcmp.eq.f32.partialorder %v2103_v16, %v475_v23  ;;  %v469_v24 = vpop.xlane.xlu0 %468  ;;  %v548_v26 = vshra.s32 %v2174_v22, 16 }
 0x2ab   :  { %v533_v12 = vsel %vm517_vm5, %v2164_v15, 64  ;;  %vm515_vm6 = vcmp.eq.f32.partialorder %v2107_v19, %v469_v24  ;;  %v2194_v41 = vcvt.s32.f32 %v578_v30 }
 0x2ac   :  { %v531_v14 = vsel %vm515_vm6, %v2164_v15, 64  ;;  %v2181_v27 = vcvt.s32.f32 %v548_v26  ;;  %v2185_v32 = vsel %vm463_vm2, %v533_v12, 2147483647 }
 0x2ad   :  { %v2188_v33 = vsel %vm463_vm2, %v531_v14, 2147483647  ;;  %v593_v43 = vshra.s32 %v2185_v32, 16 }
 0x2ae   :  { %v478_v16 = vpop.xlane.xlu0 %477  ;;  %551 = vmin.xlane.f32.xlu0 %v2181_v27  ;;  %v563_v37 = vshra.s32 %v2188_v33, 16 }
 0x2af   :  { %vm518_vm7 = vcmp.eq.f32.partialorder %v2115_v25, %v478_v16 }
 0x2b0   :  { %v534_v19 = vsel %vm518_vm7, %v2164_v15, 64  ;;  %v481_v38 = vpop.xlane.xlu1 %480  ;;  %v2196_v42 = vcvt.s32.f32 %v563_v37 }
 0x2b1   :  { %v2200_v49 = vsel %vm463_vm2, %v534_v19, 2147483647  ;;  %vm519_vm8 = vcmp.eq.f32.partialorder %v2119_v29, %v481_v38  ;;  %v2214_v29 = vcvt.s32.f32 %v593_v43 }
 0x2b2   :  { %v535_v52 = vsel %vm519_vm8, %v2164_v15, 64  ;;  %v484_v53 = vpop.xlane.xlu0 %483  ;;  %581 = vmin.xlane.f32.xlu0 %v2194_v41  ;;  %566 = vmin.xlane.f32.xlu1 %v2196_v42  ;;  %v608_v25 = vshra.s32 %v2200_v49, 16 }
 0x2b3   :  { %v2208_v55 = vsel %vm463_vm2, %v535_v52, 2147483647  ;;  %vm520_vm9 = vcmp.eq.f32.partialorder %v2117_v28, %v484_v53 }
 0x2b4   :  { %v536_v57 = vsel %vm520_vm9, %v2164_v15, 64  ;;  %v487_v61 = vpop.xlane.xlu1 %486  ;;  %v2212_v62 = vcvt.s32.f32 %v608_v25  ;;  %v623_v63 = vshra.s32 %v2208_v55, 16 }
 0x2b5   :  { %v2218_v5 = vsel %vm463_vm2, %v536_v57, 2147483647  ;;  %vm521_vm10 = vcmp.eq.f32.partialorder %v2123_v31, %v487_v61 }
 0x2b6   :  { %v537_v8 = vsel %vm521_vm10, %v2164_v15, 64  ;;  %v490_v9 = vpop.xlane.xlu0 %489  ;;  %611 = vmin.xlane.f32.xlu0 %v2212_v62  ;;  %596 = vmin.xlane.f32.xlu1 %v2214_v29  ;;  %v638_v28 = vshra.s32 %v2218_v5, 16  ;;  %v2232_v31 = vcvt.s32.f32 %v623_v63 }
 0x2b7   :  { %v2226_v11 = vsel %vm463_vm2, %v537_v8, 2147483647  ;;  %vm522_vm11 = vcmp.eq.f32.partialorder %v2129_v40, %v490_v9 }
 0x2b8   :  { %v538_v17 = vsel %vm522_vm11, %v2164_v15, 64  ;;  %v493_v10 = vpop.xlane.xlu1 %492  ;;  %v2230_v18 = vcvt.s32.f32 %v638_v28  ;;  %v653_v20 = vshra.s32 %v2226_v11, 16 }
 0x2b9   :  { %v2236_v23 = vsel %vm463_vm2, %v538_v17, 2147483647  ;;  %vm523_vm12 = vcmp.eq.f32.partialorder %v2135_v47, %v493_v10 }
 0x2ba   :  { %v539_v24 = vsel %vm523_vm12, %v2164_v15, 64  ;;  %v496_v26 = vpop.xlane.xlu0 %495  ;;  %641 = vmin.xlane.f32.xlu0 %v2230_v18  ;;  %626 = vmin.xlane.f32.xlu1 %v2232_v31  ;;  %v668_v40 = vshra.s32 %v2236_v23, 16  ;;  %v2250_v47 = vcvt.s32.f32 %v653_v20 }
 0x2bb   :  { %v2244_v12 = vsel %vm463_vm2, %v539_v24, 2147483647  ;;  %vm524_vm13 = vcmp.eq.f32.partialorder %v2133_v45, %v496_v26 }
 0x2bc   :  { %v540_v14 = vsel %vm524_vm13, %v2164_v15, 64  ;;  %v499_v30 = vpop.xlane.xlu1 %498  ;;  %v2248_v16 = vcvt.s32.f32 %v668_v40  ;;  %v683_v37 = vshra.s32 %v2244_v12, 16 }
 0x2bd   :  { %v2254_v19 = vsel %vm463_vm2, %v540_v14, 2147483647  ;;  %vm525_vm14 = vcmp.eq.f32.partialorder %v2139_v51, %v499_v30 }
 0x2be   :  { %v541_v38 = vsel %vm525_vm14, %v2164_v15, 64  ;;  %671 = vmin.xlane.f32.xlu0 %v2248_v16  ;;  %v502_v43 = vpop.xlane.xlu0 %501  ;;  %656 = vmin.xlane.f32.xlu1 %v2250_v47  ;;  %v698_v45 = vshra.s32 %v2254_v19, 16  ;;  %v2268_v51 = vcvt.s32.f32 %v683_v37 }
 0x2bf   :  { %v2262_v52 = vsel %vm463_vm2, %v541_v38, 2147483647  ;;  %vm526_vm15 = vcmp.eq.f32.partialorder %v2145_v59, %v502_v43  ;;  %v1695_v43 = vld [vmem:[#allocation7] sm:$0xff]  }
 0x2c0   :  { %v542_v53 = vsel %vm526_vm15, %v2164_v15, 64  ;;  %v505_v25 = vpop.xlane.xlu1 %504  ;;  %v2266_v57 = vcvt.s32.f32 %v698_v45  ;;  %v713_v61 = vshra.s32 %v2262_v52, 16  ;;  %v1696_v45 = vld [vmem:[#allocation7 + $0x8] sm:$0xff]   ;;  %1628 = vmatprep.subr.bf16.mxu0 %v1695_v43 }
 0x2c1   :  { %v2272_v63 = vsel %vm463_vm2, %v542_v53, 2147483647  ;;  %vm527_vm3 = vcmp.eq.f32.partialorder %v2151_v3, %v505_v25  ;;  %1629 = vmatpush3.bf16.msra.mxu0 %v1695_v43  ;;  %v1697_v53 = vld [vmem:[#allocation7 + $0x10] sm:$0xff]   ;;  %v547_v25 = vand.u32 65535, %v2174_v22  ;;  %v607_v22 = vand.u32 65535, %v2200_v49 }
 0x2c2   :  { %v543_v8 = vsel %vm527_vm3, %v2164_v15, 64  ;;  %701 = vmin.xlane.f32.xlu0 %v2266_v57  ;;  %v508_v9 = vpop.xlane.xlu0 %507  ;;  %686 = vmin.xlane.f32.xlu1 %v2268_v51  ;;  %v728_v59 = vshra.s32 %v2272_v63, 16  ;;  %v2286_v3 = vcvt.s32.f32 %v713_v61  ;;  %v637_v49 = vand.u32 65535, %v2218_v5 }
 0x2c3   :  { %v2280_v28 = vsel %vm463_vm2, %v543_v8, 2147483647  ;;  %vm528_vm4 = vcmp.eq.f32.partialorder %v2149_v1, %v508_v9  ;;  %1630 = vmatprep.subr.bf16.mxu0 %v1696_v45  ;;  %v549_v8 = vcvt.s32.f32 %v547_v25  ;;  %v577_v9 = vand.u32 65535, %v2171_v21 }
 0x2c4   :  { %v544_v17 = vsel %vm528_vm4, %v2164_v15, 64  ;;  %v511_v10 = vpop.xlane.xlu1 %510  ;;  %v2284_v20 = vcvt.s32.f32 %v728_v59  ;;  %v743_v24 = vshra.s32 %v2280_v28, 16  ;;  %v562_v59 = vand.u32 65535, %v2188_v33 }
 0x2c5   :  { %v2290_v26 = vsel %vm463_vm2, %v544_v17, 2147483647  ;;  %vm529_vm5 = vcmp.eq.f32.partialorder %v2155_v7, %v511_v10  ;;  %1631 = vmatpush3.bf16.msra.mxu0 %v1696_v45  ;;  %v609_v45 = vcvt.s32.f32 %v607_v22  ;;  %v667_v5 = vand.u32 65535, %v2236_v23 }
 0x2c6   :  { %v545_v40 = vsel %vm529_vm5, %v2164_v15, 64  ;;  %731 = vmin.xlane.f32.xlu0 %v2284_v20  ;;  %716 = vmin.xlane.f32.xlu1 %v2286_v3  ;;  %v758_v1 = vshra.s32 %v2290_v26, 16  ;;  %v2302_v37 = vcvt.s32.f32 %v743_v24  ;;  %v697_v23 = vand.u32 65535, %v2254_v19 }
 0x2c7   :  { %v2298_v14 = vsel %vm463_vm2, %v545_v40, 2147483647  ;;  %1632 = vmatprep.subr.bf16.mxu0 %v1697_v53  ;;  %v579_v40 = vcvt.s32.f32 %v577_v9  ;;  %v639_v9 = vcvt.s32.f32 %v637_v49  ;;  %v727_v19 = vand.u32 65535, %v2272_v63 }
 0x2c8   :  { %v2300_v30 = vcvt.s32.f32 %v758_v1  ;;  %v773_v38 = vshra.s32 %v2298_v14, 16  ;;  %v564_v1 = vcvt.s32.f32 %v562_v59  ;;  %v757_v63 = vand.u32 65535, %v2290_v26 }
 0x2c9   :  { %1633 = vmatpush3.bf16.msra.mxu0 %v1697_v53  ;;  %v772_v26 = vand.u32 65535, %v2298_v14  ;;  %v2390_v14 = vld [vmem:[#allocation10] sm:$0xff]  }
 0x2ca   :  { %761 = vmin.xlane.f32.xlu0 %v2300_v30  ;;  %746 = vmin.xlane.f32.xlu1 %v2302_v37  ;;  %v2307_v7 = vcvt.s32.f32 %v773_v38  ;;  %v592_v38 = vand.u32 65535, %v2185_v32  ;;  %v622_v32 = vand.u32 65535, %v2208_v55  ;;  %v652_v55 = vand.u32 65535, %v2226_v11 }
 0x2cb   :  { %v682_v11 = vand.u32 65535, %v2244_v12  ;;  %v712_v12 = vand.u32 65535, %v2262_v52  ;;  %v742_v52 = vand.u32 65535, %v2280_v28  ;;  %1670 = vmatprep.subr.bf16.mxu1 %v2390_v14 }
 0x2cc   :  { %v594_v53 = vcvt.s32.f32 %v592_v38  ;;  %v624_v59 = vcvt.s32.f32 %v622_v32  ;;  %v654_v22 = vcvt.s32.f32 %v652_v55  ;;  %v729_v32 = vcvt.s32.f32 %v727_v19  ;;  %1671 = vmatpush3.bf16.msra.mxu1 %v2390_v14 }
 0x2cd   :  { %v744_v55 = vcvt.s32.f32 %v742_v52 }
 0x2ce   :  { %776 = vmin.xlane.f32.xlu1 %v2307_v7 }
 0x33b   :  { %v2311_v61 = vpop.xlane.xlu0 %551 }
 0x33c   :  { %vm553_vm6 = vcmp.eq.f32.partialorder %v2181_v27, %v2311_v61 }
 0x33d   :  { %v554_v17 = vsel %vm553_vm6, %v549_v8, inf }
 0x33e   :  { %555 = vmin.xlane.f32.xlu0 %v554_v17 }
 0x33f   :  { %v2317_v10 = vpop.xlane.xlu0 %581  ;;  %v2319_v24 = vpop.xlane.xlu1 %566 }
 0x340   :  { %vm583_vm7 = vcmp.eq.f32.partialorder %v2194_v41, %v2317_v10  ;;  %vm568_vm8 = vcmp.eq.f32.partialorder %v2196_v42, %v2319_v24 }
 0x341   :  { %v584_v21 = vsel %vm583_vm7, %v579_v40, inf  ;;  %v569_v27 = vsel %vm568_vm8, %v564_v1, inf  ;;  %v669_v1 = vcvt.s32.f32 %v667_v5  ;;  %v759_v5 = vcvt.s32.f32 %v757_v63 }
 0x342   :  { %585 = vmin.xlane.f32.xlu0 %v584_v21  ;;  %570 = vmin.xlane.f32.xlu1 %v569_v27  ;;  %v699_v27 = vcvt.s32.f32 %v697_v23 }
 0x343   :  { %v2327_v33 = vpop.xlane.xlu0 %611  ;;  %v2329_v43 = vpop.xlane.xlu1 %596 }
 0x344   :  { %vm613_vm9 = vcmp.eq.f32.partialorder %v2212_v62, %v2327_v33  ;;  %vm598_vm10 = vcmp.eq.f32.partialorder %v2214_v29, %v2329_v43 }
 0x345   :  { %v614_v41 = vsel %vm613_vm9, %v609_v45, inf  ;;  %v599_v42 = vsel %vm598_vm10, %v594_v53, inf  ;;  %v684_v45 = vcvt.s32.f32 %v682_v11  ;;  %vm795_vm9 = vcmask 130112  }
 0x346   :  { %615 = vmin.xlane.f32.xlu0 %v614_v41  ;;  %600 = vmin.xlane.f32.xlu1 %v599_v42  ;;  %v714_v41 = vcvt.s32.f32 %v712_v12  ;;  %v1698_v42 = vld [vmem:[#allocation7 + $0x18] sm:$0xff]   ;;  %vm802_vm10 = vcmask 195712  }
 0x347   :  { %v2337_v25 = vpop.xlane.xlu0 %641  ;;  %v2339_v8 = vpop.xlane.xlu1 %626  ;;  %1634 = vmatprep.subr.bf16.mxu0 %v1698_v42 }
 0x348   :  { %vm643_vm11 = vcmp.eq.f32.partialorder %v2230_v18, %v2337_v25  ;;  %vm628_vm12 = vcmp.eq.f32.partialorder %v2232_v31, %v2339_v8  ;;  %1635 = vmatpush3.bf16.msra.mxu0 %v1698_v42  ;;  %v648_v23 = vcvt.f32.s32 %v2337_v25  ;;  %v633_v11 = vcvt.f32.s32 %v2339_v8 }
 0x349   :  { %v644_v62 = vsel %vm643_vm11, %v639_v9, inf  ;;  %v629_v29 = vsel %vm628_vm12, %v624_v59, inf  ;;  %1652 = vmatprep.subr.bf16.mxu0 %v2390_v14  ;;  %v797_v25 = vadd.s32 4294967280, %v2164_v15  ;;  %v790_v8 = vadd.s32 4294967288, %v2164_v15 }
 0x34a   :  { %645 = vmin.xlane.f32.xlu0 %v644_v62  ;;  %630 = vmin.xlane.f32.xlu1 %v629_v29  ;;  %v774_v62 = vcvt.s32.f32 %v772_v26  ;;  %v2409_v12 = vshll.u32 %v648_v23, 16  ;;  %vm809_vm12 = vcmask 261312  }
 0x34b   :  { %v2347_v17 = vpop.xlane.xlu0 %671  ;;  %v2349_v40 = vpop.xlane.xlu1 %656 }
 0x34c   :  { %vm673_vm13 = vcmp.eq.f32.partialorder %v2248_v16, %v2347_v17  ;;  %vm658_vm14 = vcmp.eq.f32.partialorder %v2250_v47, %v2349_v40 }
 0x34d   :  { %v674_v18 = vsel %vm673_vm13, %v669_v1, inf  ;;  %v659_v31 = vsel %vm658_vm14, %v654_v22, inf  ;;  %v573_v1 = vcvt.f32.s32 %v2319_v24  ;;  %v618_v22 = vcvt.f32.s32 %v2327_v33 }
 0x34e   :  { %675 = vmin.xlane.f32.xlu0 %v674_v18  ;;  %660 = vmin.xlane.f32.xlu1 %v659_v31  ;;  %v678_v18 = vcvt.f32.s32 %v2347_v17  ;;  %v2413_v17 = vshll.u32 %v633_v11, 16  ;;  %vm816_vm13 = vcmask 326912  }
 0x34f   :  { %v2357_v38 = vpop.xlane.xlu0 %701  ;;  %v2359_v21 = vpop.xlane.xlu1 %686  ;;  %v574_v24 = vshll.u32 %v573_v1, 16  ;;  %v619_v19 = vshll.u32 %v618_v22, 16 }
 0x350   :  { %vm703_vm15 = vcmp.eq.f32.partialorder %v2266_v57, %v2357_v38  ;;  %vm688_vm3 = vcmp.eq.f32.partialorder %v2268_v51, %v2359_v21  ;;  %v693_v33 = vcvt.f32.s32 %v2359_v21 }
 0x351   :  { %v704_v16 = vsel %vm703_vm15, %v699_v27, inf  ;;  %v689_v47 = vsel %vm688_vm3, %v684_v45, inf  ;;  %v663_v27 = vcvt.f32.s32 %v2349_v40  ;;  %v708_v45 = vcvt.f32.s32 %v2357_v38 }
 0x352   :  { %705 = vmin.xlane.f32.xlu0 %v704_v16  ;;  %690 = vmin.xlane.f32.xlu1 %v689_v47  ;;  %v2415_v40 = vshll.u32 %v678_v18, 16  ;;  %v2428_v63 = vshll.u32 %v693_v33, 16  ;;  %v832_v18 = vadd.s32 4294967240, %v2164_v15  ;;  %vm823_vm3 = vcmask 392512  }
 0x353   :  { %v2367_v53 = vpop.xlane.xlu0 %731  ;;  %v2369_v49 = vpop.xlane.xlu1 %716  ;;  %v2419_v16 = vshll.u32 %v663_v27, 16  ;;  %v2421_v47 = vshll.u32 %v708_v45, 16 }
 0x354   :  { %vm733_vm4 = vcmp.eq.f32.partialorder %v2284_v20, %v2367_v53  ;;  %vm718_vm5 = vcmp.eq.f32.partialorder %v2286_v3, %v2369_v49  ;;  %v738_v38 = vcvt.f32.s32 %v2367_v53  ;;  %v811_v53 = vadd.s32 4294967264, %v2164_v15 }
 0x355   :  { %v734_v57 = vsel %vm733_vm4, %v729_v32, inf  ;;  %v719_v51 = vsel %vm718_vm5, %v714_v41, inf  ;;  %v804_v32 = vadd.s32 4294967272, %v2164_v15  ;;  %vm830_vm4 = vcmask 458112  }
 0x356   :  { %735 = vmin.xlane.f32.xlu0 %v734_v57  ;;  %720 = vmin.xlane.f32.xlu1 %v719_v51 }
 0x357   :  { %v2377_v9 = vpop.xlane.xlu0 %761  ;;  %v2379_v59 = vpop.xlane.xlu1 %746 }
 0x358   :  { %vm763_vm6 = vcmp.eq.f32.partialorder %v2300_v30, %v2377_v9  ;;  %vm748_vm7 = vcmp.eq.f32.partialorder %v2302_v37, %v2379_v59  ;;  %v558_v30 = vcvt.f32.s32 %v2311_v61  ;;  %v588_v37 = vcvt.f32.s32 %v2317_v10 }
 0x359   :  { %v764_v28 = vsel %vm763_vm6, %v759_v5, inf  ;;  %v749_v20 = vsel %vm748_vm7, %v744_v55, inf  ;;  %v2406_v61 = vshrl.u32 %v512_v13, 7  ;;  %v723_v13 = vcvt.f32.s32 %v2369_v49 }
 0x35a   :  { %765 = vmin.xlane.f32.xlu0 %v764_v28  ;;  %750 = vmin.xlane.f32.xlu1 %v749_v20  ;;  %v559_v31 = vshll.u32 %v558_v30, 16  ;;  %v589_v10 = vshll.u32 %v588_v37, 16  ;;  %v768_v52 = vcvt.f32.s32 %v2377_v9  ;;  %v753_v49 = vcvt.f32.s32 %v2379_v59 }
 0x35b   :  { %v2386_v3 = vpop.xlane.xlu1 %776  ;;  %v2426_v41 = vsub.s32 %v2164_v15, %v2406_v61  ;;  %v2434_v51 = vsub.s32 %v797_v25, %v2406_v61  ;;  %v2437_v42 = vsub.s32 %v790_v8, %v2406_v61  ;;  %v825_v5 = vadd.s32 4294967248, %v2164_v15 }
 0x35c   :  { %vm778_vm8 = vcmp.eq.f32.partialorder %v2307_v7, %v2386_v3  ;;  %v603_v7 = vcvt.f32.s32 %v2329_v43  ;;  %v2440_v55 = vshll.u32 %v738_v38, 16  ;;  %v2442_v26 = vshll.u32 %v723_v13, 16 }
 0x35d   :  { %v779_v29 = vsel %vm778_vm8, %v774_v62, inf  ;;  %v818_v9 = vadd.s32 4294967256, %v2164_v15  ;;  %v783_v20 = vcvt.f32.s32 %v2386_v3  ;;  %v2447_v59 = vsub.s32 %v804_v32, %v2406_v61 }
 0x35e   :  { %780 = vmin.xlane.f32.xlu1 %v779_v29  ;;  %v604_v43 = vshll.u32 %v603_v7, 16  ;;  %v2449_v30 = vshll.u32 %v768_v52, 16  ;;  %v2452_v22 = vsub.s32 %v811_v53, %v2406_v61  ;;  %v2454_v7 = vshll.u32 %v753_v49, 16 }
 0x35f   :  { %v2458_v3 = vsub.s32 %v825_v5, %v2406_v61  ;;  %v2464_v27 = vshll.u32 %v783_v20, 16  ;;  %v853_v8 = vadd.s32 4294967216, %v2164_v15  ;;  %v839_v38 = vadd.s32 4294967232, %v2164_v15 }
 0x360   :  { %v1895_v13 = vmov 0.0   ;;  %vm2725_vm6 = vcmask 523712   ;;  %vm2724_vm8 = vcmask 589312  }
 0x3cb   :  { %v556_v21 = vpop.xlane.xlu0 %555 }
 0x3cc   :  { %v557_v57 = vcvt.f32.s32 %v556_v21 }
 0x3ce   :  { %v560_v28 = vadd.s32 %v559_v31, %v557_v57  ;;  %v2462_v31 = vsub.s32 %v818_v9, %v2406_v61 }
 0x3cf   :  { %v586_v62 = vpop.xlane.xlu0 %585  ;;  %v571_v29 = vpop.xlane.xlu1 %570 }
 0x3d0   :  { %v587_v37 = vcvt.f32.s32 %v586_v62  ;;  %v572_v1 = vcvt.f32.s32 %v571_v29  ;;  %vm896_vm11 = vcmp.eq.s32.totalorder %v2164_v15, %v560_v28  ;;  %v789_v25 = vrot.slane %v560_v28, %v2426_v41 }
 0x3d1   :  { %v2476_v28 = vsub.s32 %v832_v18, %v2406_v61  ;;  %v2480_v29 = vsub.s32 %v853_v8, %v2406_v61 }
 0x3d2   :  { %v590_v23 = vadd.s32 %v589_v10, %v587_v37  ;;  %v575_v11 = vadd.s32 %v574_v24, %v572_v1  ;;  %v1504_v10 = vsel %vm896_vm11, 1.0, %v1895_v13  ;;  %v2483_v37 = vsub.s32 %v839_v38, %v2406_v61 }
 0x3d3   :  { %v616_v45 = vpop.xlane.xlu0 %615  ;;  %v601_v33 = vpop.xlane.xlu1 %600  ;;  %v846_v1 = vadd.s32 4294967224, %v2164_v15 }
 0x3d4   :  { %vm897_vm14 = vcmp.eq.s32.totalorder %v2164_v15, %v575_v11  ;;  %v617_v24 = vcvt.f32.s32 %v616_v45  ;;  %v602_v21 = vcvt.f32.s32 %v601_v33  ;;  %vm898_vm15 = vcmp.eq.s32.totalorder %v2164_v15, %v590_v23 }
 0x3d5   :  { %v1505_v32 = vsel %vm897_vm14, 1.0, %v1895_v13  ;;  %v801_v52 = vrot.slane %v590_v23, %v2434_v51  ;;  %v794_v57 = vrot.slane %v575_v11, %v2437_v42 }
 0x3d6   :  { %v944_v53 = vpack.c.bf16 %v1505_v32, %v1504_v10  ;;  %v620_v49 = vadd.s32 %v619_v19, %v617_v24  ;;  %v605_v5 = vadd.s32 %v604_v43, %v602_v21  ;;  %v1506_v19 = vsel %vm898_vm15, 1.0, %v1895_v13 }
 0x3d7   :  { %v646_v9 = vpop.xlane.xlu0 %645  ;;  %v631_v20 = vpop.xlane.xlu1 %630  ;;  %v796_v62 = vsel %vm795_vm9, %v794_v57, %v789_v25  ;;  %v860_v32 = vadd.s32 4294967208, %v2164_v15  ;;  %v2501_v57 = vsub.s32 %v846_v1, %v2406_v61  ;;  %vm2728_vm15 = vcmask 654912  }
 0x3d8   :  { %vm899_vm5 = vcmp.eq.s32.totalorder %v2164_v15, %v605_v5  ;;  %v647_v43 = vcvt.f32.s32 %v646_v9  ;;  %v632_v11 = vcvt.f32.s32 %v631_v20  ;;  %1636 = vmatprep.mubr.msk.bf16.mxu0 %vm463_vm2, %v944_v53  ;;  %vm900_vm7 = vcmp.eq.s32.totalorder %v2164_v15, %v620_v49 }
 0x3d9   :  { %v1507_v18 = vsel %vm899_vm5, 1.0, %v1895_v13  ;;  %v808_v45 = vrot.slane %v605_v5, %v2447_v59  ;;  %v803_v33 = vsel %vm802_vm10, %v801_v52, %v796_v62  ;;  %v815_v38 = vrot.slane %v620_v49, %v2452_v22 }
 0x3da   :  { %v945_v25 = vpack.c.bf16 %v1507_v18, %v1506_v19  ;;  %v650_v8 = vadd.s32 %v2409_v12, %v647_v43  ;;  %v635_v23 = vadd.s32 %v2413_v17, %v632_v11  ;;  %v867_v53 = vadd.s32 4294967200, %v2164_v15 }
 0x3db   :  { %v676_v10 = vpop.xlane.xlu0 %675  ;;  %v661_v24 = vpop.xlane.xlu1 %660  ;;  %v810_v21 = vsel %vm809_vm12, %v808_v45, %v803_v33  ;;  %v1508_v52 = vsel %vm900_vm7, 1.0, %v1895_v13  ;;  %v2516_v18 = vsub.s32 %v860_v32, %v2406_v61  ;;  %vm2727_vm5 = vcmask 720512  }
 0x3dc   :  { %vm901_vm11 = vcmp.eq.s32.totalorder %v2164_v15, %v635_v23  ;;  %v677_v12 = vcvt.f32.s32 %v676_v10  ;;  %v662_v17 = vcvt.f32.s32 %v661_v24  ;;  %1637 = vmatmul.mubr.msk.bf16.vlgmr.msra.gmra.mrb[16].mxu0 %vm463_vm2, %v945_v25  ;;  %vm902_vm14 = vcmp.eq.s32.totalorder %v2164_v15, %v650_v8 }
 0x3dd   :  { %v1509_v49 = vsel %vm901_vm11, 1.0, %v1895_v13  ;;  %1653 = vmatpush3.bf16.msra.mxu0 %v2390_v14  ;;  %v829_v5 = vrot.slane %v650_v8, %v2458_v3  ;;  %v817_v9 = vsel %vm816_vm13, %v815_v38, %v810_v21  ;;  %v822_v19 = vrot.slane %v635_v23, %v2462_v31 }
 0x3de   :  { %v946_v20 = vpack.c.bf16 %v1509_v49, %v1508_v52  ;;  %v680_v62 = vadd.s32 %v2415_v40, %v677_v12  ;;  %v665_v1 = vadd.s32 %v2419_v16, %v662_v17  ;;  %v2519_v14 = vsub.s32 %v867_v53, %v2406_v61 }
 0x3df   :  { %v706_v43 = vpop.xlane.xlu0 %705  ;;  %v691_v11 = vpop.xlane.xlu1 %690  ;;  %v874_v45 = vadd.s32 4294967192, %v2164_v15  ;;  %v1510_v40 = vsel %vm902_vm14, 1.0, %v1895_v13  ;;  %v824_v38 = vsel %vm823_vm3, %v822_v19, %v817_v9  ;;  %vm2726_vm14 = vcmask 786112  }
 0x3e0   :  { %vm903_vm7 = vcmp.eq.s32.totalorder %v2164_v15, %v665_v1  ;;  %v707_v16 = vcvt.f32.s32 %v706_v43  ;;  %v692_v33 = vcvt.f32.s32 %v691_v11  ;;  %1640 = vmatprep.mubr.msk.bf16.mxu0 %vm463_vm2, %v946_v20  ;;  %vm904_vm11 = vcmp.eq.s32.totalorder %v2164_v15, %v680_v62 }
 0x3e1   :  { %v1511_v25 = vsel %vm903_vm7, 1.0, %v1895_v13  ;;  %v836_v23 = vrot.slane %v665_v1, %v2476_v28  ;;  %v831_v21 = vsel %vm830_vm4, %v829_v5, %v824_v38  ;;  %v843_v12 = vrot.slane %v680_v62, %v2483_v37 }
 0x3e2   :  { %v947_v10 = vpack.c.bf16 %v1511_v25, %v1510_v40  ;;  %v710_v24 = vadd.s32 %v2421_v47, %v707_v16  ;;  %v695_v8 = vadd.s32 %v2428_v63, %v692_v33  ;;  %v881_v17 = vadd.s32 4294967184, %v2164_v15 }
 0x3e3   :  { %v736_v32 = vpop.xlane.xlu0 %735  ;;  %v721_v53 = vpop.xlane.xlu1 %720  ;;  %v838_v52 = vsel %vm2725_vm6, %v836_v23, %v831_v21  ;;  %v1512_v49 = vsel %vm904_vm11, 1.0, %v1895_v13  ;;  %vm872_vm11 = vcmask 851712   ;;  %v2548_v16 = vsub.s32 %v874_v45, %v2406_v61 }
 0x3e4   :  { %vm905_vm7 = vcmp.eq.s32.totalorder %v2164_v15, %v695_v8  ;;  %v737_v9 = vcvt.f32.s32 %v736_v32  ;;  %v722_v20 = vcvt.f32.s32 %v721_v53  ;;  %1641 = vmatmul.mubr.msk.bf16.gmra.mrb[20].mxu0 %vm463_vm2, %v947_v10  ;;  %vm906_vm0 = vcmp.eq.s32.totalorder %v2164_v15, %v710_v24 }
 0x3e5   :  { %v1513_v47 = vsel %vm905_vm7, 1.0, %v1895_v13  ;;  %v857_v63 = vrot.slane %v710_v24, %v2480_v29  ;;  %v845_v5 = vsel %vm2724_vm8, %v843_v12, %v838_v52  ;;  %v850_v43 = vrot.slane %v695_v8, %v2501_v57 }
 0x3e6   :  { %v948_v62 = vpack.c.bf16 %v1513_v47, %v1512_v49  ;;  %v740_v1 = vadd.s32 %v2440_v55, %v737_v9  ;;  %v725_v19 = vadd.s32 %v2442_v26, %v722_v20  ;;  %v2551_v33 = vsub.s32 %v881_v17, %v2406_v61 }
 0x3e7   :  { %v766_v11 = vpop.xlane.xlu0 %765  ;;  %v751_v40 = vpop.xlane.xlu1 %750  ;;  %v888_v25 = vadd.s32 4294967176, %v2164_v15  ;;  %v1514_v23 = vsel %vm906_vm0, 1.0, %v1895_v13  ;;  %v852_v10 = vsel %vm2728_vm15, %v850_v43, %v845_v5  ;;  %vm879_vm0 = vcmask 917312  }
 0x3e8   :  { %vm907_vm7 = vcmp.eq.s32.totalorder %v2164_v15, %v725_v19  ;;  %v767_v55 = vcvt.f32.s32 %v766_v11  ;;  %v752_v38 = vcvt.f32.s32 %v751_v40  ;;  %1644 = vmatprep.mubr.msk.bf16.mxu0 %vm463_vm2, %v948_v62  ;;  %vm908_vm8 = vcmp.eq.s32.totalorder %v2164_v15, %v740_v1 }
 0x3e9   :  { %v1515_v26 = vsel %vm907_vm7, 1.0, %v1895_v13  ;;  %v864_v45 = vrot.slane %v725_v19, %v2516_v18  ;;  %v859_v32 = vsel %vm2727_vm5, %v857_v63, %v852_v10  ;;  %v871_v12 = vrot.slane %v740_v1, %v2519_v14 }
 0x3ea   :  { %v949_v24 = vpack.c.bf16 %v1515_v26, %v1514_v23  ;;  %v770_v8 = vadd.s32 %v2449_v30, %v767_v55  ;;  %v755_v21 = vadd.s32 %v2454_v7, %v752_v38  ;;  %vm886_vm6 = vcmask 982912  }
 0x3eb   :  { %v781_v53 = vpop.xlane.xlu1 %780  ;;  %v866_v52 = vsel %vm2726_vm14, %v864_v45, %v859_v32  ;;  %v2570_v30 = vsub.s32 %v888_v25, %v2406_v61  ;;  %v1516_v7 = vsel %vm908_vm8, 1.0, %v1895_v13  ;;  %vm893_vm5 = vcmask 1048512  }
 0x3ec   :  { %vm909_vm7 = vcmp.eq.s32.totalorder %v2164_v15, %v755_v21  ;;  %v782_v17 = vcvt.f32.s32 %v781_v53  ;;  %1645 = vmatmul.mubr.msk.bf16.gmra.mrb[24].mxu0 %vm463_vm2, %v949_v24  ;;  %v878_v49 = vrot.slane %v755_v21, %v2548_v16  ;;  %v873_v20 = vsel %vm872_vm11, %v871_v12, %v866_v52 }
 0x3ed   :  { %v1517_v9 = vsel %vm909_vm7, 1.0, %v1895_v13  ;;  %v885_v47 = vrot.slane %v770_v8, %v2551_v33  ;;  %vm910_vm14 = vcmp.eq.s32.totalorder %v2164_v15, %v770_v8 }
 0x3ee   :  { %v950_v63 = vpack.c.bf16 %v1517_v9, %v1516_v7  ;;  %v785_v5 = vadd.s32 %v2464_v27, %v782_v17  ;;  %v880_v62 = vsel %vm879_vm0, %v878_v49, %v873_v20  ;;  %v1518_v1 = vsel %vm910_vm14, 1.0, %v1895_v13 }
 0x3ef   :  { %v887_v43 = vsel %vm886_vm6, %v885_v47, %v880_v62 }
 0x3f0   :  { %vm911_vm15 = vcmp.eq.s32.totalorder %v2164_v15, %v785_v5  ;;  %1648 = vmatprep.mubr.msk.bf16.mxu0 %vm463_vm2, %v950_v63  ;;  %v892_v61 = vrot.slane %v785_v5, %v2570_v30 }
 0x3f1   :  { %v1519_v19 = vsel %vm911_vm15, 1.0, %v1895_v13 }
 0x3f2   :  { %v951_v11 = vpack.c.bf16 %v1519_v19, %v1518_v1  ;;  %v894_v40 = vsel %vm893_vm5, %v892_v61, %v887_v43 }
 0x3f3   :  { %895 = vst [vmem:[#allocation12] sm:$0x1] %v894_v40 }
 0x3f4   :  { %1649 = vmatmul.mubr.msk.bf16.gmra.mrb[28].mxu0 %vm463_vm2, %v951_v11 }
 0x4af   :  { %v1638_v27 = vpop.f32.mrb[16].mxu0 }
 0x4b0   :  { %v1107_v25 = vsub.f32 %v1638_v27, %v2027_v34  ;;  %v1042_v15 = vpop.f32.mrb[17].mxu0 }
 0x4b1   :  { %v1105_v23 = vsub.f32 %v1042_v15, %v2029_v35  ;;  %v1639_v55 = vpop.f32.mrb[18].mxu0 }
 0x4b2   :  { %v1123_v38 = vmul.f32 %v1107_v25, %v1107_v25  ;;  %v1108_v26 = vsub.f32 %v1639_v55, %v2031_v36  ;;  %v1283_v45 = vpack.c.bf16 %v1639_v55, %v1638_v27  ;;  %v1045_v13 = vpop.f32.mrb[19].mxu0 }
 0x4b3   :  { %v1106_v10 = vsub.f32 %v1045_v13, %v2037_v39  ;;  %v1282_v24 = vpack.c.bf16 %v1045_v13, %v1042_v15  ;;  %v1121_v8 = vmul.f32 %v1105_v23, %v1105_v23 }
 0x4b4   :  { %v1124_v21 = vmul.f32 %v1108_v26, %v1108_v26  ;;  %v1143_v32 = vsel %vm306_vm1, %v1123_v38, 0.0 }
 0x4b5   :  { %1144 = vadd.xlane.f32.xlu0 %v1143_v32  ;;  %1654 = vmatprep.mubr.msk.bf16.mxu0 %vm306_vm1, %v1282_v24  ;;  %v1122_v34 = vmul.f32 %v1106_v10, %v1106_v10  ;;  %v1137_v39 = vsel %vm306_vm1, %v1121_v8, 0.0 }
 0x4b6   :  { %1655 = vmatmul.mubr.msk.bf16.vlgmr.msra.gmra.mrb[32].mxu0 %vm306_vm1, %v1283_v45  ;;  %v1146_v35 = vsel %vm306_vm1, %v1124_v21, 0.0 }
 0x4b7   :  { %1147 = vadd.xlane.f32.xlu1 %v1146_v35  ;;  %v1642_v53 = vpop.f32.mrb[20].mxu0  ;;  %v1140_v47 = vsel %vm306_vm1, %v1122_v34, 0.0 }
 0x4b8   :  { %v1111_v36 = vsub.f32 %v1642_v53, %v2043_v44  ;;  %v1058_v52 = vpop.f32.mrb[21].mxu0 }
 0x4b9   :  { %v1109_v12 = vsub.f32 %v1058_v52, %v2048_v46  ;;  %1138 = vadd.xlane.f32.xlu0 %v1137_v39  ;;  %v1643_v17 = vpop.f32.mrb[22].mxu0 }
 0x4ba   :  { %v1127_v49 = vmul.f32 %v1111_v36, %v1111_v36  ;;  %v1112_v7 = vsub.f32 %v1643_v17, %v2053_v48  ;;  %v1285_v9 = vpack.c.bf16 %v1643_v17, %v1642_v53  ;;  %v1061_v20 = vpop.f32.mrb[23].mxu0 }
 0x4bb   :  { %v1110_v63 = vsub.f32 %v1061_v20, %v2057_v50  ;;  %v1284_v5 = vpack.c.bf16 %v1061_v20, %v1058_v52  ;;  %1141 = vadd.xlane.f32.xlu1 %v1140_v47  ;;  %v1125_v62 = vmul.f32 %v1109_v12, %v1109_v12 }
 0x4bc   :  { %v1128_v44 = vmul.f32 %v1112_v7, %v1112_v7  ;;  %v1155_v61 = vsel %vm306_vm1, %v1127_v49, 0.0 }
 0x4bd   :  { %1156 = vadd.xlane.f32.xlu0 %v1155_v61  ;;  %1658 = vmatprep.mubr.msk.bf16.mxu1 %vm306_vm1, %v1284_v5  ;;  %v1126_v46 = vmul.f32 %v1110_v63, %v1110_v63  ;;  %v1149_v50 = vsel %vm306_vm1, %v1125_v62, 0.0 }
 0x4be   :  { %1659 = vmatmul.mubr.msk.bf16.vlgmr.msra.gmra.mrb[16].mxu1 %vm306_vm1, %v1285_v9  ;;  %v1158_v48 = vsel %vm306_vm1, %v1128_v44, 0.0 }
 0x4bf   :  { %1159 = vadd.xlane.f32.xlu1 %v1158_v48  ;;  %v1646_v1 = vpop.f32.mrb[24].mxu0  ;;  %v1152_v55 = vsel %vm306_vm1, %v1126_v46, 0.0 }
 0x4c0   :  { %v1115_v19 = vsub.f32 %v1646_v1, %v2061_v54  ;;  %v1074_v43 = vpop.f32.mrb[25].mxu0 }
 0x4c1   :  { %v1113_v11 = vsub.f32 %v1074_v43, %v2066_v56  ;;  %1150 = vadd.xlane.f32.xlu0 %v1149_v50  ;;  %v1647_v40 = vpop.f32.mrb[26].mxu0 }
 0x4c2   :  { %v1131_v27 = vmul.f32 %v1115_v19, %v1115_v19  ;;  %v1116_v25 = vsub.f32 %v1647_v40, %v2071_v58  ;;  %v1287_v15 = vpack.c.bf16 %v1647_v40, %v1646_v1  ;;  %v1077_v23 = vpop.f32.mrb[27].mxu0 }
 0x4c3   :  { %v1114_v38 = vsub.f32 %v1077_v23, %v2075_v60  ;;  %v1286_v26 = vpack.c.bf16 %v1077_v23, %v1074_v43  ;;  %1153 = vadd.xlane.f32.xlu1 %v1152_v55  ;;  %v1129_v45 = vmul.f32 %v1113_v11, %v1113_v11 }
 0x4c4   :  { %v1132_v54 = vmul.f32 %v1116_v25, %v1116_v25  ;;  %v1167_v13 = vsel %vm306_vm1, %v1131_v27, 0.0 }
 0x4c5   :  { %1168 = vadd.xlane.f32.xlu0 %v1167_v13  ;;  %1662 = vmatprep.mubr.msk.bf16.mxu1 %vm306_vm1, %v1286_v26  ;;  %v1130_v56 = vmul.f32 %v1114_v38, %v1114_v38  ;;  %v1161_v60 = vsel %vm306_vm1, %v1129_v45, 0.0 }
 0x4c6   :  { %1663 = vmatmul.mubr.msk.bf16.gmra.mrb[20].mxu1 %vm306_vm1, %v1287_v15  ;;  %v1170_v58 = vsel %vm306_vm1, %v1132_v54, 0.0 }
 0x4c7   :  { %1171 = vadd.xlane.f32.xlu1 %v1170_v58  ;;  %v1650_v10 = vpop.f32.mrb[28].mxu0  ;;  %v1164_v36 = vsel %vm306_vm1, %v1130_v56, 0.0 }
 0x4c8   :  { %v1119_v24 = vsub.f32 %v1650_v10, %v2079_v0  ;;  %v1090_v8 = vpop.f32.mrb[29].mxu0 }
 0x4c9   :  { %v1117_v21 = vsub.f32 %v1090_v8, %v2084_v2  ;;  %1162 = vadd.xlane.f32.xlu0 %v1161_v60  ;;  %v1651_v32 = vpop.f32.mrb[30].mxu0 }
 0x4ca   :  { %v1120_v34 = vsub.f32 %v1651_v32, %v2089_v4  ;;  %v1289_v35 = vpack.c.bf16 %v1651_v32, %v1650_v10  ;;  %v1093_v53 = vpop.f32.mrb[31].mxu0  ;;  %v1135_v17 = vmul.f32 %v1119_v24, %v1119_v24 }
 0x4cb   :  { %v1133_v52 = vmul.f32 %v1117_v21, %v1117_v21  ;;  %v1118_v39 = vsub.f32 %v1093_v53, %v2093_v6  ;;  %v1288_v12 = vpack.c.bf16 %v1093_v53, %v1090_v8  ;;  %1165 = vadd.xlane.f32.xlu1 %v1164_v36 }
 0x4cc   :  { %v1136_v2 = vmul.f32 %v1120_v34, %v1120_v34  ;;  %v1179_v7 = vsel %vm306_vm1, %v1135_v17, 0.0 }
 0x4cd   :  { %v1134_v0 = vmul.f32 %v1118_v39, %v1118_v39  ;;  %1666 = vmatprep.mubr.msk.bf16.mxu1 %vm306_vm1, %v1288_v12  ;;  %v1173_v49 = vsel %vm306_vm1, %v1133_v52, 0.0 }
 0x4ce   :  { %1174 = vadd.xlane.f32.xlu0 %v1173_v49  ;;  %1667 = vmatmul.mubr.msk.bf16.gmra.mrb[24].mxu1 %vm306_vm1, %v1289_v35  ;;  %v1182_v6 = vsel %vm306_vm1, %v1136_v2, 0.0 }
 0x4cf   :  { %v1176_v4 = vsel %vm306_vm1, %v1134_v0, 0.0 }
 0x4d0   :  { %1177 = vadd.xlane.f32.xlu1 %v1176_v4 }
 0x4d2   :  { %1180 = vadd.xlane.f32.xlu0 %v1179_v7 }
 0x4d4   :  { %1183 = vadd.xlane.f32.xlu1 %v1182_v6 }
 0x4d5   :  { %1821 = shalt.err (!%p1818_p2)
}
 0x4d6   :  { %s1822_s24 = scalar_lea.hbm %s2721_s6, 16 }
 0x4d7   :  { %p1823_p3 = scmp.ne.s32.totalorder %s2721_s6, %s1822_s24  ;;  %p1826_p4 = scmp.lt.u32.totalorder %s1822_s24, %s2721_s6 }
 0x4d9   :  { %p1828_p5 = pnand %p1826_p4, %p1823_p3 }
 0x4db   :  { %1831 = shalt.err (!%p1828_p5)
}
 0x4dc   :  { %1456 = dma.vmem_to_hbm [thread:$0]  %s1454_s11, 16, %s2721_s6, [#allocation13]   ;;  %vm2729_vm1 = vcmask 523712   ;;  %vm2730_vm2 = vcmask 589312  }
 0x4dd   :  { %s1897_s6 = smov [#allocation14]  }
 0x4de   :  { %s1463_s0 = sshll.u32 %s1897_s6, 4  ;;  %s1464_s0 = int_to_ptr.vmem [resolvable:$true] %s1463_s0 }
 0x4df   :  { %s1832_s18 = scalar_lea.vmem %s1464_s0, 16  ;;  %s1836_s30 = scalar_lea.vmem %s1464_s0, 32 }
 0x4e0   :  { %p1833_p6 = scmp.ne.s32.totalorder %s1464_s0, %s1832_s18  ;;  %p1837_p7 = scmp.lt.s32.totalorder %s1464_s0, %s1464_s0 }
 0x4e1   :  { %p1838_p8 = scmp.lt.s32.totalorder %s1836_s30, %s1832_s18 }
 0x4e3   :  { %p1839_p9 = por %p1838_p8, %p1837_p7 }
 0x4e5   :  { %p1840_p10 = pnand %p1839_p9, %p1833_p6 }
 0x542   :  { %v1145_v9 = vpop.xlane.xlu0 %1144 }
 0x543   :  { %v1213_v61 = vrot.slane %v1145_v9, %v2434_v51 }
 0x544   :  { %v1148_v20 = vpop.xlane.xlu1 %1147 }
 0x545   :  { %v1218_v19 = vrot.slane %v1148_v20, %v2447_v59 }
 0x546   :  { %v1139_v47 = vpop.xlane.xlu0 %1138 }
 0x547   :  { %v1204_v5 = vrot.slane %v1139_v47, %v2426_v41 }
 0x548   :  { %v1142_v63 = vpop.xlane.xlu1 %1141 }
 0x549   :  { %v1208_v62 = vrot.slane %v1142_v63, %v2437_v42 }
 0x54a   :  { %v1157_v44 = vpop.xlane.xlu0 %1156 }
 0x54b   :  { %v1209_v46 = vsel %vm795_vm9, %v1208_v62, %v1204_v5  ;;  %v1233_v51 = vrot.slane %v1157_v44, %v2458_v3  ;;  %vm2731_vm9 = vcmask 654912  }
 0x54c   :  { %v1160_v48 = vpop.xlane.xlu1 %1159  ;;  %v1214_v1 = vsel %vm802_vm10, %v1213_v61, %v1209_v46  ;;  %vm2732_vm10 = vcmask 720512  }
 0x54d   :  { %v1219_v11 = vsel %vm809_vm12, %v1218_v19, %v1214_v1  ;;  %v1238_v59 = vrot.slane %v1160_v48, %v2476_v28  ;;  %vm2733_vm12 = vcmask 786112  }
 0x54e   :  { %v1151_v43 = vpop.xlane.xlu0 %1150 }
 0x54f   :  { %v1223_v50 = vrot.slane %v1151_v43, %v2452_v22 }
 0x550   :  { %v1154_v40 = vpop.xlane.xlu1 %1153 }
 0x551   :  { %v1224_v41 = vsel %vm816_vm13, %v1223_v50, %v1219_v11  ;;  %v1228_v42 = vrot.slane %v1154_v40, %v2462_v31 }
 0x552   :  { %v1169_v27 = vpop.xlane.xlu0 %1168 }
 0x553   :  { %v1229_v25 = vsel %vm823_vm3, %v1228_v42, %v1224_v41  ;;  %v1253_v54 = vrot.slane %v1169_v27, %v2480_v29 }
 0x554   :  { %v1172_v15 = vpop.xlane.xlu1 %1171  ;;  %v1234_v23 = vsel %vm830_vm4, %v1233_v51, %v1229_v25 }
 0x555   :  { %v1239_v38 = vsel %vm2729_vm1, %v1238_v59, %v1234_v23  ;;  %v1258_v3 = vrot.slane %v1172_v15, %v2516_v18 }
 0x556   :  { %v1163_v55 = vpop.xlane.xlu0 %1162 }
 0x557   :  { %v1243_v22 = vrot.slane %v1163_v55, %v2483_v37 }
 0x558   :  { %v1166_v26 = vpop.xlane.xlu1 %1165 }
 0x559   :  { %v1244_v45 = vsel %vm2730_vm2, %v1243_v22, %v1239_v38  ;;  %v1248_v31 = vrot.slane %v1166_v26, %v2501_v57 }
 0x55b   :  { %v1249_v13 = vsel %vm2731_vm9, %v1248_v31, %v1244_v45  ;;  %v1175_v56 = vpop.xlane.xlu0 %1174 }
 0x55c   :  { %v1254_v58 = vsel %vm2732_vm10, %v1253_v54, %v1249_v13  ;;  %v1263_v28 = vrot.slane %v1175_v56, %v2519_v14 }
 0x55d   :  { %v1259_v37 = vsel %vm2733_vm12, %v1258_v3, %v1254_v58  ;;  %v1178_v10 = vpop.xlane.xlu1 %1177 }
 0x55e   :  { %v1264_v24 = vsel %vm872_vm11, %v1263_v28, %v1259_v37  ;;  %v1268_v8 = vrot.slane %v1178_v10, %v2548_v16 }
 0x55f   :  { %v1181_v60 = vpop.xlane.xlu0 %1180 }
 0x560   :  { %v1269_v57 = vsel %vm879_vm0, %v1268_v8, %v1264_v24  ;;  %v1273_v29 = vrot.slane %v1181_v60, %v2551_v33 }
 0x561   :  { %v1184_v18 = vpop.xlane.xlu1 %1183 }
 0x562   :  { %v1274_v21 = vsel %vm886_vm6, %v1273_v29, %v1269_v57  ;;  %v1278_v32 = vrot.slane %v1184_v18, %v2570_v30 }
 0x564   :  { %v1279_v14 = vsel %vm893_vm5, %v1278_v32, %v1274_v21 }
 0x565   :  { %1281 = vst [vmem:[#allocation14] sm:$0x1] %v1279_v14 }
 0x566   :  { %1843 = shalt.err (!%p1840_p10)
}
 0x567   :  { %s1844_s10 = scalar_lea.hbm %s2722_s7, 16 }
 0x568   :  { %p1845_p11 = scmp.ne.s32.totalorder %s2722_s7, %s1844_s10  ;;  %p1848_p12 = scmp.lt.u32.totalorder %s1844_s10, %s2722_s7 }
 0x56a   :  { %p1850_p13 = pnand %p1848_p12, %p1845_p11 }
 0x56c   :  { %1853 = shalt.err (!%p1850_p13)
}
 0x56d   :  { %1466 = dma.vmem_to_hbm [thread:$0]  %s1464_s0, 16, %s2722_s7, [#allocation13]   ;;  %vm2734_vm13 = vcmask 261120  }
 0x56e   :  { %vm2735_vm3 = vmmov %vm2734_vm13  ;;  %s1898_s7 = smov [#allocation11]  }
 0x56f   :  { %vm2736_vm4 = vmmov %vm2735_vm3  ;;  %s1440_s20 = sshll.u32 %s1898_s7, 4  ;;  %s1441_s20 = int_to_ptr.vmem [resolvable:$true] %s1440_s20 }
 0x570   :  { %vm2737_vm6 = vmmov %vm2735_vm3  ;;  %s1854_s4 = scalar_lea.vmem %s1441_s20, 2048  ;;  %p1859_p1 = scmp.lt.s32.totalorder %s1441_s20, %s1441_s20 }
 0x571   :  { %vm2738_vm8 = vmmov %vm2735_vm3  ;;  %p1855_p0 = scmp.ne.s32.totalorder %s1441_s20, %s1854_s4  ;;  %p1860_p2 = scmp.lt.s32.totalorder %s1854_s4, %s1854_s4 }
 0x572   :  { %vm2739_vm15 = vmmov %vm2735_vm3 }
 0x573   :  { %vm2740_vm5 = vmmov %vm2735_vm3  ;;  %p1861_p3 = por %p1860_p2, %p1859_p1 }
 0x574   :  { %vm2741_vm14 = vmmov %vm2735_vm3 }
 0x575   :  { %vm2742_vm11 = vmmov %vm2735_vm3  ;;  %p1862_p4 = pnand %p1861_p3, %p1855_p0 }
 0x576   :  { %vm2743_vm0 = vmmov %vm2735_vm3 }
 0x577   :  { %vm2744_vm7 = vmmov %vm2743_vm0 }
 0x578   :  { %vm2745_vm1 = vmmov %vm2743_vm0 }
 0x579   :  { %vm2746_vm2 = vmmov %vm2743_vm0 }
 0x57a   :  { %vm2747_vm9 = vmmov %vm2743_vm0 }
 0x57b   :  { %vm2748_vm10 = vmmov %vm2743_vm0 }
 0x57c   :  { %vm2749_vm12 = vmmov %vm2743_vm0 }
 0x589   :  { %v1656_v16 = vpop.f32.mrb[32].mxu0 }
 0x58a   :  { %1421 = vst.msk [vmem:[#allocation11 + $0x10] sm:$0xff] %vm2734_vm13, %v1656_v16  ;;  %v1356_v33 = vpop.f32.mrb[33].mxu0 }
 0x58b   :  { %1419 = vst.msk [vmem:[#allocation11] sm:$0xff] %vm2735_vm3, %v1356_v33  ;;  %v1657_v30 = vpop.f32.mrb[34].mxu0 }
 0x58c   :  { %1422 = vst.msk [vmem:[#allocation11 + $0x18] sm:$0xff] %vm2736_vm4, %v1657_v30  ;;  %v1359_v34 = vpop.f32.mrb[35].mxu0 }
 0x58d   :  { %1420 = vst.msk [vmem:[#allocation11 + $0x8] sm:$0xff] %vm2737_vm6, %v1359_v34 }
 0x591   :  { %v1660_v35 = vpop.f32.mrb[16].mxu1 }
 0x592   :  { %1425 = vst.msk [vmem:[#allocation11 + $0x30] sm:$0xff] %vm2738_vm8, %v1660_v35  ;;  %v1372_v53 = vpop.f32.mrb[17].mxu1 }
 0x593   :  { %1423 = vst.msk [vmem:[#allocation11 + $0x20] sm:$0xff] %vm2739_vm15, %v1372_v53  ;;  %v1661_v36 = vpop.f32.mrb[18].mxu1 }
 0x594   :  { %1426 = vst.msk [vmem:[#allocation11 + $0x38] sm:$0xff] %vm2740_vm5, %v1661_v36  ;;  %v1375_v52 = vpop.f32.mrb[19].mxu1 }
 0x595   :  { %1424 = vst.msk [vmem:[#allocation11 + $0x28] sm:$0xff] %vm2741_vm14, %v1375_v52 }
 0x599   :  { %v1664_v39 = vpop.f32.mrb[20].mxu1 }
 0x59a   :  { %1429 = vst.msk [vmem:[#allocation11 + $0x50] sm:$0xff] %vm2742_vm11, %v1664_v39  ;;  %v1388_v12 = vpop.f32.mrb[21].mxu1 }
 0x59b   :  { %1427 = vst.msk [vmem:[#allocation11 + $0x40] sm:$0xff] %vm2743_vm0, %v1388_v12  ;;  %v1665_v17 = vpop.f32.mrb[22].mxu1 }
 0x59c   :  { %1430 = vst.msk [vmem:[#allocation11 + $0x58] sm:$0xff] %vm2744_vm7, %v1665_v17  ;;  %v1391_v0 = vpop.f32.mrb[23].mxu1 }
 0x59d   :  { %1428 = vst.msk [vmem:[#allocation11 + $0x48] sm:$0xff] %vm2745_vm1, %v1391_v0 }
 0x5a1   :  { %v1668_v49 = vpop.f32.mrb[24].mxu1 }
 0x5a2   :  { %1433 = vst.msk [vmem:[#allocation11 + $0x70] sm:$0xff] %vm2746_vm2, %v1668_v49  ;;  %v1404_v2 = vpop.f32.mrb[25].mxu1 }
 0x5a3   :  { %1431 = vst.msk [vmem:[#allocation11 + $0x60] sm:$0xff] %vm2747_vm9, %v1404_v2  ;;  %v1669_v4 = vpop.f32.mrb[26].mxu1 }
 0x5a4   :  { %1434 = vst.msk [vmem:[#allocation11 + $0x78] sm:$0xff] %vm2748_vm10, %v1669_v4  ;;  %v1407_v7 = vpop.f32.mrb[27].mxu1 }
 0x5a5   :  { %1432 = vst.msk [vmem:[#allocation11 + $0x68] sm:$0xff] %vm2749_vm12, %v1407_v7 }
 0x5a6   :  { %1865 = shalt.err (!%p1862_p4)
}
 0x5a7   :  { %s1866_s21 = scalar_lea.hbm %s2720_s5, 2048 }
 0x5a8   :  { %p1867_p5 = scmp.ne.s32.totalorder %s2720_s5, %s1866_s21  ;;  %p1870_p6 = scmp.lt.u32.totalorder %s1866_s21, %s2720_s5 }
 0x5aa   :  { %p1872_p7 = pnand %p1870_p6, %p1867_p5 }
 0x5ac   :  { %1875 = shalt.err (!%p1872_p7)
}
 0x5ad   :  { %1446 = dma.vmem_to_hbm [thread:$0]  %s1441_s20, 2048, %s2720_s5, [#allocation4], %s1891_s3, %s1891_s3, %s1892_s16  }
 0x5ae   :  { %1882 = dma.done.wait [#allocation4], 2048  }
 0x5af   :  { %1883 = vsyncadd [#allocation4], 4294965248 }
 0x5b0   :  { %1884 = dma.done.wait [#allocation13], 32  }
 0x5b1   :  { %1885 = vsyncadd [#allocation13], 4294967264 }
 0x5b2   :  { %1476 = vsyncpa [#allocation3], 1 }
 0x5b3   :  { %1477 = vsyncpa [#allocation6], 1 }
 0x5b4   :  { %1478 = vsyncpa [#allocation9], 1 }
 0x5b5   :  { %1479 = vsyncpa [#allocation4], 1 }
 0x5b6   :  { %1480 = vsyncpa [#allocation13], 1 }

</bundles_post_ra>
